<compile_context>
chip_gen: v7x
topology: tpu7x:2x2x1
jax: 0.10.0
libtpu: 0.0.40
codegen_flags: <defaults>
</compile_context>

<pallas_src>
import jax
import jax.numpy as jnp
from jax.experimental import pallas as pl
from jax.experimental.pallas import tpu as pltpu


def _round_up(x, m):
    return (x + m - 1) // m * m


def _mlp_fused_kernel(x_ref, w1_ref, b1_ref, w2_ref, b2_ref, w3_ref, b3_ref, o_ref):
    # Layer 1: (tm, Kp) @ (Kp, H1) + b1, ReLU. MXU matmul, f32 accumulation.
    h = jnp.dot(x_ref[...], w1_ref[...], preferred_element_type=jnp.float32)
    h = jnp.maximum(h + b1_ref[...], 0.0)
    # Layer 2: (tm, H1) @ (H1, H2) + b2, ReLU. Intermediate stays in VMEM/vregs.
    h = jnp.dot(h.astype(w2_ref.dtype), w2_ref[...], preferred_element_type=jnp.float32)
    h = jnp.maximum(h + b2_ref[...], 0.0)
    # Output layer, lane-padded to Np=128 columns -> unmasked lane-dense store.
    y = jnp.dot(h.astype(w3_ref.dtype), w3_ref[...], preferred_element_type=jnp.float32)
    y = y + b3_ref[...]
    o_ref[...] = y.astype(o_ref.dtype)


def mlp_forward(x, params, input_size=784, tile_m=128):
    """Fused forward: logits = W3 @ relu(W2 @ relu(W1 @ x + b1) + b2) + b3."""
    x = x.reshape(-1, input_size).astype(jnp.float32)  # x.view(-1, input_size)
    M = x.shape[0]

    (w1, b1), (w2, b2), (w3, b3) = params
    K, H1 = w1.shape
    H2 = w2.shape[1]
    N = w3.shape[1]
    assert K == input_size and w2.shape[0] == H1 and w3.shape[0] == H2

    # Lane-align feature dims: K -> multiple of 128 (784 -> 896), logits N -> 128.
    Kp = _round_up(K, 128)
    Np = _round_up(N, 128)

    # MXU-aligned batch tile, capped for tiny batches; pad ragged batch with zeros.
    tm = min(tile_m, _round_up(M, 8))
    Mp = _round_up(M, tm)

    x_p = jnp.pad(x, ((0, Mp - M), (0, Kp - K)))
    w1_p = jnp.pad(w1, ((0, Kp - K), (0, 0)))          # zero K-pad: contributes 0
    w3_p = jnp.pad(w3, ((0, 0), (0, Np - N)))          # zero lane-pad of logits
    b1_2d = b1.reshape(1, H1)
    b2_2d = b2.reshape(1, H2)
    b3_2d = jnp.pad(b3, (0, Np - N)).reshape(1, Np)

    flops = 2 * Mp * (Kp * H1 + H1 * H2 + H2 * Np)
    bytes_accessed = 4 * (
        Mp * Kp + Kp * H1 + H1 + H1 * H2 + H2 + H2 * Np + Np + Mp * Np
    )

    out = pl.pallas_call(
        _mlp_fused_kernel,
        out_shape=jax.ShapeDtypeStruct((Mp, Np), jnp.float32),
        grid_spec=pltpu.PrefetchScalarGridSpec(
            num_scalar_prefetch=0,
            grid=(Mp // tm,),
            in_specs=[
                pl.BlockSpec((tm, Kp), lambda i: (i, 0)),   # batch tile of x
                pl.BlockSpec((Kp, H1), lambda i: (0, 0)),   # W1 (VMEM-resident)
                pl.BlockSpec((1, H1), lambda i: (0, 0)),    # b1
                pl.BlockSpec((H1, H2), lambda i: (0, 0)),   # W2
                pl.BlockSpec((1, H2), lambda i: (0, 0)),    # b2
                pl.BlockSpec((H2, Np), lambda i: (0, 0)),   # W3 (lane-padded)
                pl.BlockSpec((1, Np), lambda i: (0, 0)),    # b3 (lane-padded)
            ],
            out_specs=pl.BlockSpec((tm, Np), lambda i: (i, 0)),
        ),
        compiler_params=pltpu.CompilerParams(
            dimension_semantics=("parallel",),  # shards batch tiles across v7x TCs
        ),
        cost_estimate=pl.CostEstimate(
            flops=flops, transcendentals=0, bytes_accessed=bytes_accessed
        ),
    )(x_p, w1_p, b1_2d, w2, b2_2d, w3_p, b3_2d)

    # Strip batch padding and the 118 zero logit lanes.
    return out[:M, :N]


def init_mlp_params(key, input_size=784, hidden_sizes=(512, 256), n_classes=10,
                    dtype=jnp.float32):
    """Deterministic Kaiming-uniform-like init (mirrors nn.Linear default shapes)."""
    sizes = [input_size] + list(hidden_sizes) + [n_classes]
    params = []
    for in_sz, out_sz in zip(sizes[:-1], sizes[1:]):
        key, kw, kb = jax.random.split(key, 3)
        bound = 1.0 / jnp.sqrt(in_sz)
        # Stored as (in, out) == transpose of PyTorch's (out, in) weight.
        w = jax.random.uniform(kw, (in_sz, out_sz), dtype, -bound, bound)
        b = jax.random.uniform(kb, (out_sz,), dtype, -bound, bound)
        params.append((w, b))
    return params


def _reference_forward(x, params, input_size=784):
    x = x.reshape(-1, input_size).astype(jnp.float32)
    out = x
    for w, b in params[:-1]:
        out = jnp.maximum(out @ w + b, 0.0)
    w, b = params[-1]
    return out @ w + b


if __name__ == "__main__":
    key = jax.random.PRNGKey(0)
    k_params, k_x = jax.random.split(key)

    input_size = 784
    hidden_sizes = (512, 256)
    n_classes = 10
    batch = 8

    params = init_mlp_params(k_params, input_size, hidden_sizes, n_classes)
    # MNIST-like input (batch, 1, 28, 28); forward flattens to (batch, 784).
    x = jax.random.normal(k_x, (batch, 1, 28, 28), dtype=jnp.float32)

    logits = mlp_forward(x, params, input_size=input_size)
    jax.block_until_ready(logits)

    assert logits.shape == (batch, n_classes)

    # Loose numerical check against a pure-JAX reference (f32 MXU matmul tolerance).
    ref = _reference_forward(x, params, input_size=input_size)
    assert jnp.allclose(logits, ref, rtol=2e-2, atol=2e-2)

    print("KERNEL_OK")
</pallas_src>

<mosaic_0001>
module attributes {stable_mosaic.version = 11 : i64} {
  func.func @_mlp_fused_kernel(%arg0: i32, %arg1: memref<8x896xf32, #tpu.memory_space<vmem>>, %arg2: memref<896x512xf32, #tpu.memory_space<vmem>>, %arg3: memref<1x512xf32, #tpu.memory_space<vmem>>, %arg4: memref<512x256xf32, #tpu.memory_space<vmem>>, %arg5: memref<1x256xf32, #tpu.memory_space<vmem>>, %arg6: memref<256x128xf32, #tpu.memory_space<vmem>>, %arg7: memref<1x128xf32, #tpu.memory_space<vmem>>, %arg8: memref<8x128xf32, #tpu.memory_space<vmem>>) attributes {dimension_semantics = [#tpu.dimension_semantics<parallel>], iteration_bounds = array<i64: 1>, scalar_prefetch = 0 : i64, scratch_operands = 0 : i64, tpu.core_type = #tpu.core_type<tc>, window_params = [{transform_indices = @transform_0, window_bounds = array<i64: 8, 896>}, {pipeline_mode = #tpu.pipeline_mode<synchronous>, transform_indices = @transform_1, window_bounds = array<i64: 896, 512>}, {pipeline_mode = #tpu.pipeline_mode<synchronous>, transform_indices = @transform_2, window_bounds = array<i64: 1, 512>}, {pipeline_mode = #tpu.pipeline_mode<synchronous>, transform_indices = @transform_3, window_bounds = array<i64: 512, 256>}, {pipeline_mode = #tpu.pipeline_mode<synchronous>, transform_indices = @transform_4, window_bounds = array<i64: 1, 256>}, {pipeline_mode = #tpu.pipeline_mode<synchronous>, transform_indices = @transform_5, window_bounds = array<i64: 256, 128>}, {pipeline_mode = #tpu.pipeline_mode<synchronous>, transform_indices = @transform_6, window_bounds = array<i64: 1, 128>}, {transform_indices = @transform_7, window_bounds = array<i64: 8, 128>}]} {
    %c0 = arith.constant 0 : index
    %c0_0 = arith.constant 0 : index
    %0 = vector.load %arg1[%c0, %c0_0] : memref<8x896xf32, #tpu.memory_space<vmem>>, vector<8x896xf32>
    %c0_1 = arith.constant 0 : index
    %c0_2 = arith.constant 0 : index
    %1 = vector.load %arg2[%c0_1, %c0_2] : memref<896x512xf32, #tpu.memory_space<vmem>>, vector<896x512xf32>
    %cst = arith.constant dense<0.000000e+00> : vector<8x512xf32>
    %2 = tpu.matmul %0, %1, %cst {dimension_numbers = #tpu.dot_dimension_numbers<[1], [0], [0], [1], [0, 0, 1, 1], [], []>} : vector<8x896xf32>, vector<896x512xf32>, vector<8x512xf32> -> vector<8x512xf32>
    %c0_3 = arith.constant 0 : index
    %c0_4 = arith.constant 0 : index
    %3 = vector.load %arg3[%c0_3, %c0_4] : memref<1x512xf32, #tpu.memory_space<vmem>>, vector<1x512xf32>
    %4 = vector.broadcast %3 : vector<1x512xf32> to vector<8x512xf32>
    %5 = arith.addf %2, %4 : vector<8x512xf32>
    %cst_5 = arith.constant 0.000000e+00 : f32
    %6 = vector.broadcast %cst_5 : f32 to vector<8x512xf32>
    %7 = arith.maximumf %5, %6 : vector<8x512xf32>
    %c0_6 = arith.constant 0 : index
    %c0_7 = arith.constant 0 : index
    %8 = vector.load %arg4[%c0_6, %c0_7] : memref<512x256xf32, #tpu.memory_space<vmem>>, vector<512x256xf32>
    %cst_8 = arith.constant dense<0.000000e+00> : vector<8x256xf32>
    %9 = tpu.matmul %7, %8, %cst_8 {dimension_numbers = #tpu.dot_dimension_numbers<[1], [0], [0], [1], [0, 0, 1, 1], [], []>} : vector<8x512xf32>, vector<512x256xf32>, vector<8x256xf32> -> vector<8x256xf32>
    %c0_9 = arith.constant 0 : index
    %c0_10 = arith.constant 0 : index
    %10 = vector.load %arg5[%c0_9, %c0_10] : memref<1x256xf32, #tpu.memory_space<vmem>>, vector<1x256xf32>
    %11 = vector.broadcast %10 : vector<1x256xf32> to vector<8x256xf32>
    %12 = arith.addf %9, %11 : vector<8x256xf32>
    %cst_11 = arith.constant 0.000000e+00 : f32
    %13 = vector.broadcast %cst_11 : f32 to vector<8x256xf32>
    %14 = arith.maximumf %12, %13 : vector<8x256xf32>
    %c0_12 = arith.constant 0 : index
    %c0_13 = arith.constant 0 : index
    %15 = vector.load %arg6[%c0_12, %c0_13] : memref<256x128xf32, #tpu.memory_space<vmem>>, vector<256x128xf32>
    %cst_14 = arith.constant dense<0.000000e+00> : vector<8x128xf32>
    %16 = tpu.matmul %14, %15, %cst_14 {dimension_numbers = #tpu.dot_dimension_numbers<[1], [0], [0], [1], [0, 0, 1, 1], [], []>} : vector<8x256xf32>, vector<256x128xf32>, vector<8x128xf32> -> vector<8x128xf32>
    %c0_15 = arith.constant 0 : index
    %c0_16 = arith.constant 0 : index
    %17 = vector.load %arg7[%c0_15, %c0_16] : memref<1x128xf32, #tpu.memory_space<vmem>>, vector<1x128xf32>
    %18 = vector.broadcast %17 : vector<1x128xf32> to vector<8x128xf32>
    %19 = arith.addf %16, %18 : vector<8x128xf32>
    %c0_17 = arith.constant 0 : index
    %c0_18 = arith.constant 0 : index
    %20 = vector.load %arg8[%c0_17, %c0_18] : memref<8x128xf32, #tpu.memory_space<vmem>>, vector<8x128xf32>
    tpu.vector_store %arg8[%c0_17, %c0_18], %19 {strides = array<i32>} : memref<8x128xf32, #tpu.memory_space<vmem>>, vector<8x128xf32>,
    return
  }
  func.func @transform_0(%arg0: i32) -> (i32, i32) {
    %c0_i32 = arith.constant 0 : i32
    %c0_i32_0 = arith.constant 0 : i32
    return %arg0, %c0_i32 : i32, i32
  }
  func.func @transform_1(%arg0: i32) -> (i32, i32) {
    %c0_i32 = arith.constant 0 : i32
    %c0_i32_0 = arith.constant 0 : i32
    %c0_i32_1 = arith.constant 0 : i32
    return %c0_i32, %c0_i32_0 : i32, i32
  }
  func.func @transform_2(%arg0: i32) -> (i32, i32) {
    %c0_i32 = arith.constant 0 : i32
    %c0_i32_0 = arith.constant 0 : i32
    %c0_i32_1 = arith.constant 0 : i32
    return %c0_i32, %c0_i32_0 : i32, i32
  }
  func.func @transform_3(%arg0: i32) -> (i32, i32) {
    %c0_i32 = arith.constant 0 : i32
    %c0_i32_0 = arith.constant 0 : i32
    %c0_i32_1 = arith.constant 0 : i32
    return %c0_i32, %c0_i32_0 : i32, i32
  }
  func.func @transform_4(%arg0: i32) -> (i32, i32) {
    %c0_i32 = arith.constant 0 : i32
    %c0_i32_0 = arith.constant 0 : i32
    %c0_i32_1 = arith.constant 0 : i32
    return %c0_i32, %c0_i32_0 : i32, i32
  }
  func.func @transform_5(%arg0: i32) -> (i32, i32) {
    %c0_i32 = arith.constant 0 : i32
    %c0_i32_0 = arith.constant 0 : i32
    %c0_i32_1 = arith.constant 0 : i32
    return %c0_i32, %c0_i32_0 : i32, i32
  }
  func.func @transform_6(%arg0: i32) -> (i32, i32) {
    %c0_i32 = arith.constant 0 : i32
    %c0_i32_0 = arith.constant 0 : i32
    %c0_i32_1 = arith.constant 0 : i32
    return %c0_i32, %c0_i32_0 : i32, i32
  }
  func.func @transform_7(%arg0: i32) -> (i32, i32) {
    %c0_i32 = arith.constant 0 : i32
    %c0_i32_0 = arith.constant 0 : i32
    return %arg0, %c0_i32 : i32, i32
  }
}

</mosaic_0001>

<bundles_post_ra>
// kernel: tpu_custom_call.1
= control target key start
LH: loop header
LB: loop body
LE: loop exit
PB: predicated region body
PF: predicated region fallthrough
CT: control target
= control target key end

     0   :  { %12 = vsyncpa [#allocation3], 0  ;;  %s2638_s0 = inlined_call_operand.hbm [shape: f32[8,896], index: 0, kind: input, shape index: {}]   ;;  %s2639_s1 = inlined_call_operand.hbm [shape: f32[896,512], index: 1, kind: input, shape index: {}]   ;;  %s2640_s2 = inlined_call_operand.hbm [shape: f32[1,512], index: 2, kind: input, shape index: {}]   ;;  %s2641_s3 = inlined_call_operand.hbm [shape: f32[512,256], index: 3, kind: input, shape index: {}]   ;;  %s2642_s4 = inlined_call_operand.hbm [shape: f32[1,256], index: 4, kind: input, shape index: {}]   ;;  %s2643_s5 = inlined_call_operand.hbm [shape: f32[256,128], index: 5, kind: input, shape index: {}]   ;;  %s2644_s6 = inlined_call_operand.hbm [shape: f32[1,128], index: 6, kind: input, shape index: {}]   ;;  %s2645_s7 = inlined_call_operand.hbm [shape: f32[8,128], index: 7, kind: output, shape index: {}]  }
   0x1   :  { %13 = vsyncpa [#allocation6], 0 }
   0x2   :  { %14 = vsyncpa [#allocation9], 0 }
   0x3   :  { %15 = vsyncpa [#allocation12], 0 }
   0x4   :  { %16 = vsyncpa [#allocation4], 0  ;;  %s2441_s24 = smov [#allocation5]   ;;  %s2255_s28 = scalar_lea.hbm %s2639_s1, 57344 }
   0x5   :  { %s32_s25 = sshll.u32 %s2441_s24, 4  ;;  %p2256_p0 = scmp.ne.s32.totalorder %s2639_s1, %s2255_s28  ;;  %s33_s25 = int_to_ptr.vmem [resolvable:$true] %s32_s25 }
   0x6   :  { %p2259_p1 = scmp.lt.u32.totalorder %s2255_s28, %s2639_s1 }
   0x8   :  { %p2261_p2 = pnand %p2259_p1, %p2256_p0 }
   0xa   :  { %2264 = shalt.err (!%p2261_p2)
}
   0xb   :  { %s2265_s10 = scalar_lea.vmem %s33_s25, 57344  ;;  %p2270_p4 = scmp.lt.s32.totalorder %s33_s25, %s33_s25 }
   0xc   :  { %p2266_p3 = scmp.ne.s32.totalorder %s33_s25, %s2265_s10  ;;  %p2271_p5 = scmp.lt.s32.totalorder %s2265_s10, %s2265_s10 }
   0xe   :  { %p2272_p6 = por %p2271_p5, %p2270_p4 }
  0x10   :  { %p2273_p7 = pnand %p2272_p6, %p2266_p3 }
  0x12   :  { %2276 = shalt.err (!%p2273_p7)
}
  0x13   :  { %s2442_s11 = smov 512   ;;  %s2443_s12 = smov 32  }
  0x14   :  { %38 = dma.hbm_to_vmem [thread:$0]  %s2639_s1, 57344, %s33_s25, [#allocation6], %s2442_s11, %s2442_s11, %s2443_s12  }
  0x15   :  { %s2444_s15 = smov [#allocation8]   ;;  %s2277_s19 = scalar_lea.hbm %s2641_s3, 16384 }
  0x16   :  { %s54_s16 = sshll.u32 %s2444_s15, 4  ;;  %p2278_p8 = scmp.ne.s32.totalorder %s2641_s3, %s2277_s19  ;;  %s55_s16 = int_to_ptr.vmem [resolvable:$true] %s54_s16 }
  0x17   :  { %p2281_p9 = scmp.lt.u32.totalorder %s2277_s19, %s2641_s3 }
  0x19   :  { %p2283_p10 = pnand %p2281_p9, %p2278_p8 }
  0x1b   :  { %2286 = shalt.err (!%p2283_p10)
}
  0x1c   :  { %s2287_s24 = scalar_lea.vmem %s55_s16, 16384  ;;  %p2292_p12 = scmp.lt.s32.totalorder %s55_s16, %s55_s16 }
  0x1d   :  { %p2288_p11 = scmp.ne.s32.totalorder %s55_s16, %s2287_s24  ;;  %p2293_p13 = scmp.lt.s32.totalorder %s2287_s24, %s2287_s24 }
  0x1f   :  { %p2294_p0 = por %p2293_p13, %p2292_p12 }
  0x21   :  { %p2295_p1 = pnand %p2294_p0, %p2288_p11 }
  0x23   :  { %2298 = shalt.err (!%p2295_p1)
}
  0x24   :  { %s2445_s1 = smov 256   ;;  %s2446_s25 = smov 16  }
  0x25   :  { %60 = dma.hbm_to_vmem [thread:$0]  %s2641_s3, 16384, %s55_s16, [#allocation9], %s2445_s1, %s2445_s1, %s2446_s25  }
  0x26   :  { %s2447_s28 = smov [#allocation11]   ;;  %s2299_s9 = scalar_lea.hbm %s2643_s5, 4096 }
  0x27   :  { %s76_s29 = sshll.u32 %s2447_s28, 4  ;;  %p2300_p2 = scmp.ne.s32.totalorder %s2643_s5, %s2299_s9  ;;  %s77_s29 = int_to_ptr.vmem [resolvable:$true] %s76_s29 }
  0x28   :  { %p2303_p3 = scmp.lt.u32.totalorder %s2299_s9, %s2643_s5 }
  0x2a   :  { %p2305_p4 = pnand %p2303_p3, %p2300_p2 }
  0x2c   :  { %2308 = shalt.err (!%p2305_p4)
}
  0x2d   :  { %s2309_s14 = scalar_lea.vmem %s77_s29, 4096  ;;  %p2314_p6 = scmp.lt.s32.totalorder %s77_s29, %s77_s29 }
  0x2e   :  { %p2310_p5 = scmp.ne.s32.totalorder %s77_s29, %s2309_s14  ;;  %p2315_p7 = scmp.lt.s32.totalorder %s2309_s14, %s2309_s14 }
  0x30   :  { %p2316_p8 = por %p2315_p7, %p2314_p6 }
  0x32   :  { %p2317_p9 = pnand %p2316_p8, %p2310_p5 }
  0x34   :  { %2320 = shalt.err (!%p2317_p9)
}
  0x35   :  { %s2448_s3 = smov 128   ;;  %s2449_s15 = smov 8  }
  0x36   :  { %82 = dma.hbm_to_vmem [thread:$0]  %s2643_s5, 4096, %s77_s29, [#allocation12], %s2448_s3, %s2448_s3, %s2449_s15  }
  0x37   :  { %s2450_s18 = smov [#allocation2]   ;;  %s2451_s20 = smov [#allocation7]  }
  0x38   :  { %s23_s19 = sshll.u32 %s2450_s18, 4  ;;  %s45_s21 = sshll.u32 %s2451_s20, 4  ;;  %s24_s19 = int_to_ptr.vmem [resolvable:$true] %s23_s19  ;;  %s46_s21 = int_to_ptr.vmem [resolvable:$true] %s45_s21 }
  0x39   :  { %s2321_s24 = scalar_lea.hbm %s2638_s0, 896 }
  0x3a   :  { %p2322_p10 = scmp.ne.s32.totalorder %s2638_s0, %s2321_s24  ;;  %p2325_p11 = scmp.lt.u32.totalorder %s2321_s24, %s2638_s0 }
  0x3c   :  { %p2327_p12 = pnand %p2325_p11, %p2322_p10 }
  0x3e   :  { %2330 = shalt.err (!%p2327_p12)
}
  0x3f   :  { %s2331_s5 = scalar_lea.vmem %s24_s19, 896  ;;  %p2336_p0 = scmp.lt.s32.totalorder %s24_s19, %s24_s19 }
  0x40   :  { %p2332_p13 = scmp.ne.s32.totalorder %s24_s19, %s2331_s5  ;;  %p2337_p1 = scmp.lt.s32.totalorder %s2331_s5, %s2331_s5 }
  0x42   :  { %p2338_p2 = por %p2337_p1, %p2336_p0 }
  0x44   :  { %p2339_p3 = pnand %p2338_p2, %p2332_p13 }
  0x46   :  { %2342 = shalt.err (!%p2339_p3)
}
  0x47   :  { %26 = dma.hbm_to_vmem [thread:$0]  %s2638_s0, 896, %s24_s19, [#allocation3]  }
  0x48   :  { %s2343_s9 = scalar_lea.hbm %s2640_s2, 64 }
  0x49   :  { %p2344_p4 = scmp.ne.s32.totalorder %s2640_s2, %s2343_s9  ;;  %p2347_p5 = scmp.lt.u32.totalorder %s2343_s9, %s2640_s2 }
  0x4b   :  { %p2349_p6 = pnand %p2347_p5, %p2344_p4 }
  0x4d   :  { %2352 = shalt.err (!%p2349_p6)
}
  0x4e   :  { %s2353_s14 = scalar_lea.vmem %s46_s21, 64  ;;  %p2358_p8 = scmp.lt.s32.totalorder %s46_s21, %s46_s21 }
  0x4f   :  { %p2354_p7 = scmp.ne.s32.totalorder %s46_s21, %s2353_s14  ;;  %p2359_p9 = scmp.lt.s32.totalorder %s2353_s14, %s2353_s14 }
  0x51   :  { %p2360_p10 = por %p2359_p9, %p2358_p8 }
  0x53   :  { %p2361_p11 = pnand %p2360_p10, %p2354_p7 }
  0x55   :  { %2364 = shalt.err (!%p2361_p11)
}
  0x56   :  { %48 = dma.hbm_to_vmem [thread:$0]  %s2640_s2, 64, %s46_s21, [#allocation6]  }
  0x57   :  { %s2452_s15 = smov [#allocation10]   ;;  %s2453_s17 = smov [#allocation13]  }
  0x58   :  { %s67_s16 = sshll.u32 %s2452_s15, 4  ;;  %s89_s18 = sshll.u32 %s2453_s17, 4  ;;  %s68_s16 = int_to_ptr.vmem [resolvable:$true] %s67_s16  ;;  %s90_s18 = int_to_ptr.vmem [resolvable:$true] %s89_s18 }
  0x59   :  { %s2365_s22 = scalar_lea.hbm %s2642_s4, 32 }
  0x5a   :  { %p2366_p12 = scmp.ne.s32.totalorder %s2642_s4, %s2365_s22  ;;  %p2369_p13 = scmp.lt.u32.totalorder %s2365_s22, %s2642_s4 }
  0x5c   :  { %p2371_p0 = pnand %p2369_p13, %p2366_p12 }
  0x5e   :  { %2374 = shalt.err (!%p2371_p0)
}
  0x5f   :  { %s2375_s2 = scalar_lea.vmem %s68_s16, 32  ;;  %p2380_p2 = scmp.lt.s32.totalorder %s68_s16, %s68_s16 }
  0x60   :  { %p2376_p1 = scmp.ne.s32.totalorder %s68_s16, %s2375_s2  ;;  %p2381_p3 = scmp.lt.s32.totalorder %s2375_s2, %s2375_s2 }
  0x62   :  { %p2382_p4 = por %p2381_p3, %p2380_p2 }
  0x64   :  { %p2383_p5 = pnand %p2382_p4, %p2376_p1 }
  0x66   :  { %2386 = shalt.err (!%p2383_p5)
}
  0x67   :  { %70 = dma.hbm_to_vmem [thread:$0]  %s2642_s4, 32, %s68_s16, [#allocation9]  }
  0x68   :  { %s2387_s28 = scalar_lea.hbm %s2644_s6, 16 }
  0x69   :  { %p2388_p6 = scmp.ne.s32.totalorder %s2644_s6, %s2387_s28  ;;  %p2391_p7 = scmp.lt.u32.totalorder %s2387_s28, %s2644_s6 }
  0x6b   :  { %p2393_p8 = pnand %p2391_p7, %p2388_p6 }
  0x6d   :  { %2396 = shalt.err (!%p2393_p8)
}
  0x6e   :  { %s2397_s10 = scalar_lea.vmem %s90_s18, 16  ;;  %s2401_s11 = scalar_lea.vmem %s90_s18, 32 }
  0x6f   :  { %p2398_p9 = scmp.ne.s32.totalorder %s90_s18, %s2397_s10  ;;  %p2402_p10 = scmp.lt.s32.totalorder %s90_s18, %s90_s18 }
  0x70   :  { %p2403_p11 = scmp.lt.s32.totalorder %s2401_s11, %s2397_s10 }
  0x72   :  { %p2404_p12 = por %p2403_p11, %p2402_p10 }
  0x74   :  { %p2405_p13 = pnand %p2404_p12, %p2398_p9 }
  0x76   :  { %2408 = shalt.err (!%p2405_p13)
}
  0x77   :  { %92 = dma.hbm_to_vmem [thread:$0]  %s2644_s6, 16, %s90_s18, [#allocation12]  }
  0x78   :  { %2431 = dma.done.wait [#allocation3], 896  }
  0x79   :  { %2432 = vsyncadd [#allocation3], 4294966400 }
  0x7a   :  { %2433 = dma.done.wait [#allocation6], 57408  }
  0x7b   :  { %2434 = vsyncadd [#allocation6], 4294909888 }
  0x7c   :  { %2435 = dma.done.wait [#allocation9], 16416  }
  0x7d   :  { %2436 = vsyncadd [#allocation9], 4294950880 }
  0x7e   :  { %2437 = dma.done.wait [#allocation12], 4112  }
  0x7f   :  { %2438 = vsyncadd [#allocation12], 4294963184  ;;  %v122_v0 = vld [vmem:[#allocation5 + $0x8] sm:$0xff]  ;;  %v121_v5 = vld [vmem:[#allocation5] sm:$0xff]  ;;  %s2455_s6 = smov [#allocation14]  }
  0x80   :  { %v126_v1 = vld [vmem:[#allocation5 + $0x28] sm:$0xff]  ;;  %v125_v6 = vld [vmem:[#allocation5 + $0x20] sm:$0xff]  ;;  %s1563_s13 = sshll.u32 %s2455_s6, 4  ;;  %s1564_s13 = int_to_ptr.vmem [resolvable:$true] %s1563_s13 }
  0x81   :  { %v250_v2 = vld [vmem:[#allocation5 + $0x408] sm:$0xff]  ;;  %v1611_v3 = vpack.c.bf16 %v126_v1, %v122_v0  ;;  %v1613_v8 = vpack.c.bf16 %v125_v6, %v121_v5  ;;  %v249_v9 = vld [vmem:[#allocation5 + $0x400] sm:$0xff]  ;;  %s2409_s14 = scalar_lea.vmem %s1564_s13, 128  ;;  %p2414_p1 = scmp.lt.s32.totalorder %s1564_s13, %s1564_s13 }
  0x82   :  { %v254_v4 = vld [vmem:[#allocation5 + $0x428] sm:$0xff]  ;;  %v253_v10 = vld [vmem:[#allocation5 + $0x420] sm:$0xff]  ;;  %p2410_p0 = scmp.ne.s32.totalorder %s1564_s13, %s2409_s14  ;;  %p2415_p2 = scmp.lt.s32.totalorder %s2409_s14, %s2409_s14 }
  0x83   :  { %v1675_v7 = vpack.c.bf16 %v254_v4, %v250_v2  ;;  %v130_v11 = vld [vmem:[#allocation5 + $0x48] sm:$0xff]  ;;  %1612 = vmatprep.subr.bf16.mxu1 %v1611_v3  ;;  %v1677_v12 = vpack.c.bf16 %v253_v10, %v249_v9  ;;  %v129_v18 = vld [vmem:[#allocation5 + $0x40] sm:$0xff] }
  0x84   :  { %v134_v13 = vld [vmem:[#allocation5 + $0x68] sm:$0xff]  ;;  %1614 = vmatpush1.bf16.msra.mxu1 %v1613_v8  ;;  %v133_v19 = vld [vmem:[#allocation5 + $0x60] sm:$0xff]  ;;  %p2416_p3 = por %p2415_p2, %p2414_p1 }
  0x85   :  { %v258_v14 = vld [vmem:[#allocation5 + $0x448] sm:$0xff]  ;;  %1676 = vmatprep.subr.bf16.mxu0 %v1675_v7  ;;  %v1615_v16 = vpack.c.bf16 %v134_v13, %v130_v11  ;;  %v257_v20 = vld [vmem:[#allocation5 + $0x440] sm:$0xff]  ;;  %v1617_v21 = vpack.c.bf16 %v133_v19, %v129_v18 }
  0x86   :  { %v262_v15 = vld [vmem:[#allocation5 + $0x468] sm:$0xff]  ;;  %1678 = vmatpush1.bf16.msra.mxu0 %v1677_v12  ;;  %v261_v22 = vld [vmem:[#allocation5 + $0x460] sm:$0xff]  ;;  %p2417_p4 = pnand %p2416_p3, %p2410_p0 }
  0x87   :  { %v1679_v17 = vpack.c.bf16 %v262_v15, %v258_v14  ;;  %v138_v23 = vld [vmem:[#allocation5 + $0x88] sm:$0xff]  ;;  %1616 = vmatprep.subr.bf16.mxu1 %v1615_v16  ;;  %v1681_v25 = vpack.c.bf16 %v261_v22, %v257_v20  ;;  %v137_v29 = vld [vmem:[#allocation5 + $0x80] sm:$0xff] }
  0x88   :  { %v142_v24 = vld [vmem:[#allocation5 + $0xa8] sm:$0xff]  ;;  %v141_v31 = vld [vmem:[#allocation5 + $0xa0] sm:$0xff]  ;;  %1618 = vmatpush1.bf16.msra.mxu1 %v1617_v21 }
  0x89   :  { %1680 = vmatprep.subr.bf16.mxu0 %v1679_v17  ;;  %v1619_v26 = vpack.c.bf16 %v142_v24, %v138_v23  ;;  %v266_v27 = vld [vmem:[#allocation5 + $0x488] sm:$0xff]  ;;  %v265_v32 = vld [vmem:[#allocation5 + $0x480] sm:$0xff]  ;;  %v1621_v34 = vpack.c.bf16 %v141_v31, %v137_v29 }
  0x8a   :  { %v270_v28 = vld [vmem:[#allocation5 + $0x4a8] sm:$0xff]  ;;  %v269_v33 = vld [vmem:[#allocation5 + $0x4a0] sm:$0xff]  ;;  %1682 = vmatpush1.bf16.msra.mxu0 %v1681_v25 }
  0x8b   :  { %v1683_v30 = vpack.c.bf16 %v270_v28, %v266_v27  ;;  %v146_v35 = vld [vmem:[#allocation5 + $0xc8] sm:$0xff]  ;;  %1620 = vmatprep.subr.bf16.mxu1 %v1619_v26  ;;  %v1685_v38 = vpack.c.bf16 %v269_v33, %v265_v32  ;;  %v145_v41 = vld [vmem:[#allocation5 + $0xc0] sm:$0xff] }
  0x8c   :  { %v150_v36 = vld [vmem:[#allocation5 + $0xe8] sm:$0xff]  ;;  %v149_v42 = vld [vmem:[#allocation5 + $0xe0] sm:$0xff]  ;;  %1622 = vmatpush1.bf16.msra.mxu1 %v1621_v34 }
  0x8d   :  { %v274_v37 = vld [vmem:[#allocation5 + $0x4c8] sm:$0xff]  ;;  %v1623_v39 = vpack.c.bf16 %v150_v36, %v146_v35  ;;  %1684 = vmatprep.subr.bf16.mxu0 %v1683_v30  ;;  %v273_v44 = vld [vmem:[#allocation5 + $0x4c0] sm:$0xff]  ;;  %v1625_v50 = vpack.c.bf16 %v149_v42, %v145_v41 }
  0x8e   :  { %v278_v40 = vld [vmem:[#allocation5 + $0x4e8] sm:$0xff]  ;;  %v277_v45 = vld [vmem:[#allocation5 + $0x4e0] sm:$0xff]  ;;  %1686 = vmatpush1.bf16.msra.mxu0 %v1685_v38 }
  0x8f   :  { %v1687_v43 = vpack.c.bf16 %v278_v40, %v274_v37  ;;  %v154_v46 = vld [vmem:[#allocation5 + $0x108] sm:$0xff]  ;;  %1624 = vmatprep.subr.bf16.mxu1 %v1623_v39  ;;  %v1689_v51 = vpack.c.bf16 %v277_v45, %v273_v44  ;;  %v153_v53 = vld [vmem:[#allocation5 + $0x100] sm:$0xff] }
  0x90   :  { %v158_v47 = vld [vmem:[#allocation5 + $0x128] sm:$0xff]  ;;  %v157_v54 = vld [vmem:[#allocation5 + $0x120] sm:$0xff]  ;;  %1626 = vmatpush1.bf16.msra.mxu1 %v1625_v50 }
  0x91   :  { %v282_v48 = vld [vmem:[#allocation5 + $0x508] sm:$0xff]  ;;  %v1627_v52 = vpack.c.bf16 %v158_v47, %v154_v46  ;;  %v281_v55 = vld [vmem:[#allocation5 + $0x500] sm:$0xff]  ;;  %1688 = vmatprep.subr.bf16.mxu0 %v1687_v43  ;;  %v1629_v62 = vpack.c.bf16 %v157_v54, %v153_v53 }
  0x92   :  { %v286_v49 = vld [vmem:[#allocation5 + $0x528] sm:$0xff]  ;;  %v285_v57 = vld [vmem:[#allocation5 + $0x520] sm:$0xff]  ;;  %1690 = vmatpush1.bf16.msra.mxu0 %v1689_v51 }
  0x93   :  { %v1691_v56 = vpack.c.bf16 %v286_v49, %v282_v48  ;;  %v162_v58 = vld [vmem:[#allocation5 + $0x148] sm:$0xff]  ;;  %1628 = vmatprep.subr.bf16.mxu1 %v1627_v52  ;;  %v1693_v63 = vpack.c.bf16 %v285_v57, %v281_v55  ;;  %v161_v1 = vld [vmem:[#allocation5 + $0x140] sm:$0xff] }
  0x94   :  { %v166_v59 = vld [vmem:[#allocation5 + $0x168] sm:$0xff]  ;;  %v165_v2 = vld [vmem:[#allocation5 + $0x160] sm:$0xff]  ;;  %1630 = vmatpush1.bf16.msra.mxu1 %v1629_v62 }
  0x95   :  { %v290_v60 = vld [vmem:[#allocation5 + $0x548] sm:$0xff]  ;;  %v1631_v0 = vpack.c.bf16 %v166_v59, %v162_v58  ;;  %v289_v3 = vld [vmem:[#allocation5 + $0x540] sm:$0xff]  ;;  %1692 = vmatprep.subr.bf16.mxu0 %v1691_v56  ;;  %v1633_v10 = vpack.c.bf16 %v165_v2, %v161_v1 }
  0x96   :  { %v294_v61 = vld [vmem:[#allocation5 + $0x568] sm:$0xff]  ;;  %v293_v5 = vld [vmem:[#allocation5 + $0x560] sm:$0xff]  ;;  %1694 = vmatpush1.bf16.msra.mxu0 %v1693_v63 }
  0x97   :  { %v1695_v4 = vpack.c.bf16 %v294_v61, %v290_v60  ;;  %v170_v6 = vld [vmem:[#allocation5 + $0x188] sm:$0xff]  ;;  %1632 = vmatprep.subr.bf16.mxu1 %v1631_v0  ;;  %v1697_v11 = vpack.c.bf16 %v293_v5, %v289_v3  ;;  %v169_v13 = vld [vmem:[#allocation5 + $0x180] sm:$0xff] }
  0x98   :  { %v174_v7 = vld [vmem:[#allocation5 + $0x1a8] sm:$0xff]  ;;  %v173_v14 = vld [vmem:[#allocation5 + $0x1a0] sm:$0xff]  ;;  %1634 = vmatpush1.bf16.msra.mxu1 %v1633_v10 }
  0x99   :  { %v298_v8 = vld [vmem:[#allocation5 + $0x588] sm:$0xff]  ;;  %v1635_v12 = vpack.c.bf16 %v174_v7, %v170_v6  ;;  %v297_v15 = vld [vmem:[#allocation5 + $0x580] sm:$0xff]  ;;  %1696 = vmatprep.subr.bf16.mxu0 %v1695_v4  ;;  %v1637_v22 = vpack.c.bf16 %v173_v14, %v169_v13 }
  0x9a   :  { %v302_v9 = vld [vmem:[#allocation5 + $0x5a8] sm:$0xff]  ;;  %v301_v17 = vld [vmem:[#allocation5 + $0x5a0] sm:$0xff]  ;;  %1698 = vmatpush1.bf16.msra.mxu0 %v1697_v11 }
  0x9b   :  { %v1699_v16 = vpack.c.bf16 %v302_v9, %v298_v8  ;;  %v178_v18 = vld [vmem:[#allocation5 + $0x1c8] sm:$0xff]  ;;  %1636 = vmatprep.subr.bf16.mxu1 %v1635_v12  ;;  %v1701_v23 = vpack.c.bf16 %v301_v17, %v297_v15  ;;  %v177_v25 = vld [vmem:[#allocation5 + $0x1c0] sm:$0xff] }
  0x9c   :  { %v182_v19 = vld [vmem:[#allocation5 + $0x1e8] sm:$0xff]  ;;  %v181_v26 = vld [vmem:[#allocation5 + $0x1e0] sm:$0xff]  ;;  %1638 = vmatpush1.bf16.msra.mxu1 %v1637_v22 }
  0x9d   :  { %v306_v20 = vld [vmem:[#allocation5 + $0x5c8] sm:$0xff]  ;;  %v1639_v24 = vpack.c.bf16 %v182_v19, %v178_v18  ;;  %v305_v27 = vld [vmem:[#allocation5 + $0x5c0] sm:$0xff]  ;;  %1700 = vmatprep.subr.bf16.mxu0 %v1699_v16  ;;  %v1641_v34 = vpack.c.bf16 %v181_v26, %v177_v25  ;;  %v2580_v16 = vld [vmem:[#allocation2 + $0x8] sm:$0xff] }
  0x9e   :  { %v310_v21 = vld [vmem:[#allocation5 + $0x5e8] sm:$0xff]  ;;  %v309_v29 = vld [vmem:[#allocation5 + $0x5e0] sm:$0xff]  ;;  %1702 = vmatpush1.bf16.msra.mxu0 %v1701_v23  ;;  %655 = vmatprep.mubr.f32.mxu1 %v2580_v16 }
  0x9f   :  { %v1703_v28 = vpack.c.bf16 %v310_v21, %v306_v20  ;;  %v186_v30 = vld [vmem:[#allocation5 + $0x208] sm:$0xff]  ;;  %1640 = vmatprep.subr.bf16.mxu1 %v1639_v24  ;;  %v1705_v35 = vpack.c.bf16 %v309_v29, %v305_v27  ;;  %v185_v37 = vld [vmem:[#allocation5 + $0x200] sm:$0xff] }
  0xa0   :  { %v190_v31 = vld [vmem:[#allocation5 + $0x228] sm:$0xff]  ;;  %v189_v38 = vld [vmem:[#allocation5 + $0x220] sm:$0xff]  ;;  %1642 = vmatpush1.bf16.msra.mxu1 %v1641_v34 }
  0xa1   :  { %v314_v32 = vld [vmem:[#allocation5 + $0x608] sm:$0xff]  ;;  %v1643_v36 = vpack.c.bf16 %v190_v31, %v186_v30  ;;  %v313_v39 = vld [vmem:[#allocation5 + $0x600] sm:$0xff]  ;;  %1704 = vmatprep.subr.bf16.mxu0 %v1703_v28  ;;  %v1645_v46 = vpack.c.bf16 %v189_v38, %v185_v37 }
  0xa2   :  { %v318_v33 = vld [vmem:[#allocation5 + $0x628] sm:$0xff]  ;;  %v317_v41 = vld [vmem:[#allocation5 + $0x620] sm:$0xff]  ;;  %1706 = vmatpush1.bf16.msra.mxu0 %v1705_v35 }
  0xa3   :  { %v1707_v40 = vpack.c.bf16 %v318_v33, %v314_v32  ;;  %v194_v42 = vld [vmem:[#allocation5 + $0x248] sm:$0xff]  ;;  %1644 = vmatprep.subr.bf16.mxu1 %v1643_v36  ;;  %v1709_v47 = vpack.c.bf16 %v317_v41, %v313_v39  ;;  %v193_v49 = vld [vmem:[#allocation5 + $0x240] sm:$0xff] }
  0xa4   :  { %v198_v43 = vld [vmem:[#allocation5 + $0x268] sm:$0xff]  ;;  %v197_v50 = vld [vmem:[#allocation5 + $0x260] sm:$0xff]  ;;  %1646 = vmatpush1.bf16.msra.mxu1 %v1645_v46 }
  0xa5   :  { %v322_v44 = vld [vmem:[#allocation5 + $0x648] sm:$0xff]  ;;  %v1647_v48 = vpack.c.bf16 %v198_v43, %v194_v42  ;;  %v321_v51 = vld [vmem:[#allocation5 + $0x640] sm:$0xff]  ;;  %1708 = vmatprep.subr.bf16.mxu0 %v1707_v40  ;;  %v1649_v58 = vpack.c.bf16 %v197_v50, %v193_v49 }
  0xa6   :  { %v326_v45 = vld [vmem:[#allocation5 + $0x668] sm:$0xff]  ;;  %v325_v53 = vld [vmem:[#allocation5 + $0x660] sm:$0xff]  ;;  %1710 = vmatpush1.bf16.msra.mxu0 %v1709_v47 }
  0xa7   :  { %v1711_v52 = vpack.c.bf16 %v326_v45, %v322_v44  ;;  %v202_v54 = vld [vmem:[#allocation5 + $0x288] sm:$0xff]  ;;  %1648 = vmatprep.subr.bf16.mxu1 %v1647_v48  ;;  %v1713_v59 = vpack.c.bf16 %v325_v53, %v321_v51  ;;  %v201_v61 = vld [vmem:[#allocation5 + $0x280] sm:$0xff] }
  0xa8   :  { %v206_v55 = vld [vmem:[#allocation5 + $0x2a8] sm:$0xff]  ;;  %v205_v62 = vld [vmem:[#allocation5 + $0x2a0] sm:$0xff]  ;;  %1650 = vmatpush1.bf16.msra.mxu1 %v1649_v58 }
  0xa9   :  { %v330_v56 = vld [vmem:[#allocation5 + $0x688] sm:$0xff]  ;;  %v1651_v60 = vpack.c.bf16 %v206_v55, %v202_v54  ;;  %v329_v63 = vld [vmem:[#allocation5 + $0x680] sm:$0xff]  ;;  %1712 = vmatprep.subr.bf16.mxu0 %v1711_v52  ;;  %v1653_v6 = vpack.c.bf16 %v205_v62, %v201_v61 }
  0xaa   :  { %v334_v57 = vld [vmem:[#allocation5 + $0x6a8] sm:$0xff]  ;;  %v333_v1 = vld [vmem:[#allocation5 + $0x6a0] sm:$0xff]  ;;  %1714 = vmatpush1.bf16.msra.mxu0 %v1713_v59 }
  0xab   :  { %v1715_v0 = vpack.c.bf16 %v334_v57, %v330_v56  ;;  %v210_v2 = vld [vmem:[#allocation5 + $0x2c8] sm:$0xff]  ;;  %v209_v7 = vld [vmem:[#allocation5 + $0x2c0] sm:$0xff]  ;;  %1652 = vmatprep.subr.bf16.mxu1 %v1651_v60  ;;  %v1717_v8 = vpack.c.bf16 %v333_v1, %v329_v63  ;;  %v128_v1 = vld [vmem:[#allocation5 + $0x38] sm:$0xff] }
  0xac   :  { %v214_v3 = vld [vmem:[#allocation5 + $0x2e8] sm:$0xff]  ;;  %v213_v10 = vld [vmem:[#allocation5 + $0x2e0] sm:$0xff]  ;;  %1654 = vmatpush1.bf16.msra.mxu1 %v1653_v6 }
  0xad   :  { %v338_v4 = vld [vmem:[#allocation5 + $0x6c8] sm:$0xff]  ;;  %v1655_v9 = vpack.c.bf16 %v214_v3, %v210_v2  ;;  %v337_v11 = vld [vmem:[#allocation5 + $0x6c0] sm:$0xff]  ;;  %1716 = vmatprep.subr.bf16.mxu0 %v1715_v0  ;;  %v1657_v20 = vpack.c.bf16 %v213_v10, %v209_v7  ;;  %v124_v0 = vld [vmem:[#allocation5 + $0x18] sm:$0xff] }
  0xae   :  { %v342_v5 = vld [vmem:[#allocation5 + $0x6e8] sm:$0xff]  ;;  %v341_v12 = vld [vmem:[#allocation5 + $0x6e0] sm:$0xff]  ;;  %1718 = vmatpush1.bf16.msra.mxu0 %v1717_v8  ;;  %v1835_v6 = vpack.c.bf16 %v128_v1, %v124_v0  ;;  %v123_v8 = vld [vmem:[#allocation5 + $0x10] sm:$0xff] }
  0xaf   :  { %v1719_v13 = vpack.c.bf16 %v342_v5, %v338_v4  ;;  %v218_v14 = vld [vmem:[#allocation5 + $0x308] sm:$0xff]  ;;  %v2583_v19 = vld [vmem:[#allocation2 + $0x18] sm:$0xff]  ;;  %1656 = vmatprep.subr.bf16.mxu1 %v1655_v9  ;;  %v1721_v21 = vpack.c.bf16 %v341_v12, %v337_v11  ;;  %v127_v9 = vld [vmem:[#allocation5 + $0x30] sm:$0xff] }
  0xb0   :  { %v222_v15 = vld [vmem:[#allocation5 + $0x328] sm:$0xff]  ;;  %726 = vmatprep.mubr.f32.mxu0 %v2583_v19  ;;  %v217_v23 = vld [vmem:[#allocation5 + $0x300] sm:$0xff]  ;;  %1658 = vmatpush1.bf16.msra.mxu1 %v1657_v20  ;;  %v132_v12 = vld [vmem:[#allocation5 + $0x58] sm:$0xff]  ;;  %v1837_v20 = vpack.c.bf16 %v127_v9, %v123_v8 }
  0xb1   :  { %v346_v17 = vld [vmem:[#allocation5 + $0x708] sm:$0xff]  ;;  %v1659_v22 = vpack.c.bf16 %v222_v15, %v218_v14  ;;  %v221_v24 = vld [vmem:[#allocation5 + $0x320] sm:$0xff]  ;;  %1720 = vmatprep.subr.bf16.mxu0 %v1719_v13  ;;  %v136_v13 = vld [vmem:[#allocation5 + $0x78] sm:$0xff] }
  0xb2   :  { %v350_v18 = vld [vmem:[#allocation5 + $0x728] sm:$0xff]  ;;  %v345_v25 = vld [vmem:[#allocation5 + $0x700] sm:$0xff]  ;;  %v1661_v32 = vpack.c.bf16 %v221_v24, %v217_v23  ;;  %1722 = vmatpush1.bf16.msra.mxu0 %v1721_v21  ;;  %v131_v24 = vld [vmem:[#allocation5 + $0x50] sm:$0xff] }
  0xb3   :  { %v1723_v26 = vpack.c.bf16 %v350_v18, %v346_v17  ;;  %v349_v27 = vld [vmem:[#allocation5 + $0x720] sm:$0xff]  ;;  %v226_v28 = vld [vmem:[#allocation5 + $0x348] sm:$0xff]  ;;  %1660 = vmatprep.subr.bf16.mxu1 %v1659_v22  ;;  %v116_v18 = vld [vmem:[#allocation2 + $0x10] sm:$0xff]  ;;  %v1839_v22 = vpack.c.bf16 %v136_v13, %v132_v12 }
  0xb4   :  { %v230_v29 = vld [vmem:[#allocation5 + $0x368] sm:$0xff]  ;;  %v1725_v33 = vpack.c.bf16 %v349_v27, %v345_v25  ;;  %v225_v35 = vld [vmem:[#allocation5 + $0x340] sm:$0xff]  ;;  %1662 = vmatpush1.bf16.msra.mxu1 %v1661_v32  ;;  %v135_v25 = vld [vmem:[#allocation5 + $0x70] sm:$0xff] }
  0xb5   :  { %v354_v30 = vld [vmem:[#allocation5 + $0x748] sm:$0xff]  ;;  %v1663_v34 = vpack.c.bf16 %v230_v29, %v226_v28  ;;  %v229_v36 = vld [vmem:[#allocation5 + $0x360] sm:$0xff]  ;;  %1724 = vmatprep.subr.bf16.mxu0 %v1723_v26  ;;  %v140_v28 = vld [vmem:[#allocation5 + $0x98] sm:$0xff]  ;;  %v1841_v32 = vpack.c.bf16 %v135_v25, %v131_v24 }
  0xb6   :  { %v358_v31 = vld [vmem:[#allocation5 + $0x768] sm:$0xff]  ;;  %v353_v37 = vld [vmem:[#allocation5 + $0x740] sm:$0xff]  ;;  %v1665_v44 = vpack.c.bf16 %v229_v36, %v225_v35  ;;  %1726 = vmatpush1.bf16.msra.mxu0 %v1725_v33  ;;  %v144_v29 = vld [vmem:[#allocation5 + $0xb8] sm:$0xff] }
  0xb7   :  { %v1727_v38 = vpack.c.bf16 %v358_v31, %v354_v30  ;;  %v357_v39 = vld [vmem:[#allocation5 + $0x760] sm:$0xff]  ;;  %v234_v40 = vld [vmem:[#allocation5 + $0x388] sm:$0xff]  ;;  %1664 = vmatprep.subr.bf16.mxu1 %v1663_v34  ;;  %v1843_v34 = vpack.c.bf16 %v144_v29, %v140_v28  ;;  %v139_v36 = vld [vmem:[#allocation5 + $0x90] sm:$0xff] }
  0xb8   :  { %v238_v41 = vld [vmem:[#allocation5 + $0x3a8] sm:$0xff]  ;;  %v1729_v45 = vpack.c.bf16 %v357_v39, %v353_v37  ;;  %v233_v47 = vld [vmem:[#allocation5 + $0x380] sm:$0xff]  ;;  %1666 = vmatpush1.bf16.msra.mxu1 %v1665_v44  ;;  %v143_v37 = vld [vmem:[#allocation5 + $0xb0] sm:$0xff] }
  0xb9   :  { %v362_v42 = vld [vmem:[#allocation5 + $0x788] sm:$0xff]  ;;  %v1667_v46 = vpack.c.bf16 %v238_v41, %v234_v40  ;;  %v237_v48 = vld [vmem:[#allocation5 + $0x3a0] sm:$0xff]  ;;  %1728 = vmatprep.subr.bf16.mxu0 %v1727_v38  ;;  %v148_v40 = vld [vmem:[#allocation5 + $0xd8] sm:$0xff]  ;;  %v1845_v44 = vpack.c.bf16 %v143_v37, %v139_v36 }
  0xba   :  { %v366_v43 = vld [vmem:[#allocation5 + $0x7a8] sm:$0xff]  ;;  %v361_v49 = vld [vmem:[#allocation5 + $0x780] sm:$0xff]  ;;  %v1669_v56 = vpack.c.bf16 %v237_v48, %v233_v47  ;;  %1730 = vmatpush1.bf16.msra.mxu0 %v1729_v45  ;;  %v152_v41 = vld [vmem:[#allocation5 + $0xf8] sm:$0xff] }
  0xbb   :  { %v1731_v50 = vpack.c.bf16 %v366_v43, %v362_v42  ;;  %v365_v51 = vld [vmem:[#allocation5 + $0x7a0] sm:$0xff]  ;;  %v242_v52 = vld [vmem:[#allocation5 + $0x3c8] sm:$0xff]  ;;  %1668 = vmatprep.subr.bf16.mxu1 %v1667_v46  ;;  %v1847_v46 = vpack.c.bf16 %v152_v41, %v148_v40  ;;  %v147_v48 = vld [vmem:[#allocation5 + $0xd0] sm:$0xff] }
  0xbc   :  { %v246_v53 = vld [vmem:[#allocation5 + $0x3e8] sm:$0xff]  ;;  %v1733_v57 = vpack.c.bf16 %v365_v51, %v361_v49  ;;  %v241_v59 = vld [vmem:[#allocation5 + $0x3c0] sm:$0xff]  ;;  %1670 = vmatpush1.bf16.msra.mxu1 %v1669_v56  ;;  %v151_v49 = vld [vmem:[#allocation5 + $0xf0] sm:$0xff] }
  0xbd   :  { %v370_v54 = vld [vmem:[#allocation5 + $0x7c8] sm:$0xff]  ;;  %v1671_v58 = vpack.c.bf16 %v246_v53, %v242_v52  ;;  %v245_v60 = vld [vmem:[#allocation5 + $0x3e0] sm:$0xff]  ;;  %1732 = vmatprep.subr.bf16.mxu0 %v1731_v50  ;;  %v156_v52 = vld [vmem:[#allocation5 + $0x118] sm:$0xff] }
  0xbe   :  { %v374_v55 = vld [vmem:[#allocation5 + $0x7e8] sm:$0xff]  ;;  %v369_v61 = vld [vmem:[#allocation5 + $0x7c0] sm:$0xff]  ;;  %v1673_v4 = vpack.c.bf16 %v245_v60, %v241_v59  ;;  %1734 = vmatpush1.bf16.msra.mxu0 %v1733_v57  ;;  %v160_v53 = vld [vmem:[#allocation5 + $0x138] sm:$0xff] }
  0xbf   :  { %v1735_v62 = vpack.c.bf16 %v374_v55, %v370_v54  ;;  %v373_v63 = vld [vmem:[#allocation5 + $0x7e0] sm:$0xff]  ;;  %v378_v2 = vld [vmem:[#allocation5 + $0x808] sm:$0xff]  ;;  %1672 = vmatprep.subr.bf16.mxu1 %v1671_v58  ;;  %v1851_v57 = vpack.c.bf16 %v160_v53, %v156_v52  ;;  %v155_v59 = vld [vmem:[#allocation5 + $0x110] sm:$0xff] }
  0xc0   :  { %v382_v3 = vld [vmem:[#allocation5 + $0x828] sm:$0xff]  ;;  %v1737_v5 = vpack.c.bf16 %v373_v63, %v369_v61  ;;  %v377_v7 = vld [vmem:[#allocation5 + $0x800] sm:$0xff]  ;;  %1674 = vmatpush1.bf16.msra.mxu1 %v1673_v4  ;;  %v159_v60 = vld [vmem:[#allocation5 + $0x130] sm:$0xff] }
  0xc1   :  { %1736 = vmatprep.subr.bf16.mxu0 %v1735_v62  ;;  %v1739_v10 = vpack.c.bf16 %v382_v3, %v378_v2  ;;  %v381_v11 = vld [vmem:[#allocation5 + $0x820] sm:$0xff]  ;;  %v386_v14 = vld [vmem:[#allocation5 + $0x848] sm:$0xff]  ;;  %1836 = vmatprep.subr.bf16.mxu1 %v1835_v6  ;;  %v164_v63 = vld [vmem:[#allocation5 + $0x158] sm:$0xff]  ;;  %v1853_v3 = vpack.c.bf16 %v159_v60, %v155_v59 }
  0xc2   :  { %v390_v15 = vld [vmem:[#allocation5 + $0x868] sm:$0xff]  ;;  %1738 = vmatpush1.bf16.msra.mxu0 %v1737_v5  ;;  %v1741_v21 = vpack.c.bf16 %v381_v11, %v377_v7  ;;  %v385_v23 = vld [vmem:[#allocation5 + $0x840] sm:$0xff]  ;;  %v168_v0 = vld [vmem:[#allocation5 + $0x178] sm:$0xff] }
  0xc3   :  { %v2586_v17 = vld [vmem:[#allocation2] sm:$0xff]  ;;  %1740 = vmatprep.subr.bf16.mxu0 %v1739_v10  ;;  %v1743_v26 = vpack.c.bf16 %v390_v15, %v386_v14  ;;  %v389_v27 = vld [vmem:[#allocation5 + $0x860] sm:$0xff]  ;;  %v1855_v5 = vpack.c.bf16 %v168_v0, %v164_v63  ;;  %v163_v7 = vld [vmem:[#allocation5 + $0x150] sm:$0xff] }
  0xc4   :  { %656 = vmatmul.mubr.f32.vlgmr.msra.gmra.mrb[0].mxu1 %v2586_v17  ;;  %v394_v30 = vld [vmem:[#allocation5 + $0x888] sm:$0xff]  ;;  %v1745_v33 = vpack.c.bf16 %v389_v27, %v385_v23  ;;  %v393_v35 = vld [vmem:[#allocation5 + $0x880] sm:$0xff]  ;;  %v167_v8 = vld [vmem:[#allocation5 + $0x170] sm:$0xff] }
  0xc5   :  { %v398_v31 = vld [vmem:[#allocation5 + $0x8a8] sm:$0xff]  ;;  %727 = vmatmul.mubr.f32.vlgmr.msra.gmra.mrb[0].mxu0 %v116_v18  ;;  %1838 = vmatpush1.bf16.msra.mxu1 %v1837_v20  ;;  %v397_v39 = vld [vmem:[#allocation5 + $0x8a0] sm:$0xff]  ;;  %v172_v11 = vld [vmem:[#allocation5 + $0x198] sm:$0xff]  ;;  %v1857_v15 = vpack.c.bf16 %v167_v8, %v163_v7 }
  0xc6   :  { %1742 = vmatpush1.bf16.msra.mxu0 %v1741_v21  ;;  %1840 = vmatprep.subr.bf16.mxu1 %v1839_v22  ;;  %v1747_v38 = vpack.c.bf16 %v398_v31, %v394_v30  ;;  %v402_v42 = vld [vmem:[#allocation5 + $0x8c8] sm:$0xff]  ;;  %v1749_v45 = vpack.c.bf16 %v397_v39, %v393_v35  ;;  %v401_v47 = vld [vmem:[#allocation5 + $0x8c0] sm:$0xff]  ;;  %v176_v12 = vld [vmem:[#allocation5 + $0x1b8] sm:$0xff] }
  0xc7   :  { %1744 = vmatprep.subr.bf16.mxu0 %v1743_v26  ;;  %939 = vmatprep.mubr.f32.mxu1 %v2580_v16  ;;  %v406_v43 = vld [vmem:[#allocation5 + $0x8e8] sm:$0xff]  ;;  %v405_v51 = vld [vmem:[#allocation5 + $0x8e0] sm:$0xff]  ;;  %v1849_v16 = vpack.c.bf16 %v151_v49, %v147_v48  ;;  %v1859_v21 = vpack.c.bf16 %v176_v12, %v172_v11  ;;  %v171_v23 = vld [vmem:[#allocation5 + $0x190] sm:$0xff] }
  0xc8   :  { %v1751_v50 = vpack.c.bf16 %v406_v43, %v402_v42  ;;  %v410_v54 = vld [vmem:[#allocation5 + $0x908] sm:$0xff]  ;;  %v1753_v56 = vpack.c.bf16 %v405_v51, %v401_v47  ;;  %v409_v58 = vld [vmem:[#allocation5 + $0x900] sm:$0xff]  ;;  %v175_v24 = vld [vmem:[#allocation5 + $0x1b0] sm:$0xff] }
  0xc9   :  { %1842 = vmatpush1.bf16.msra.mxu1 %v1841_v32  ;;  %v414_v55 = vld [vmem:[#allocation5 + $0x928] sm:$0xff]  ;;  %v413_v62 = vld [vmem:[#allocation5 + $0x920] sm:$0xff]  ;;  %v180_v26 = vld [vmem:[#allocation5 + $0x1d8] sm:$0xff]  ;;  %v1861_v31 = vpack.c.bf16 %v175_v24, %v171_v23 }
  0xca   :  { %1746 = vmatpush1.bf16.msra.mxu0 %v1745_v33  ;;  %1844 = vmatprep.subr.bf16.mxu1 %v1843_v34  ;;  %v1755_v61 = vpack.c.bf16 %v414_v55, %v410_v54  ;;  %v418_v1 = vld [vmem:[#allocation5 + $0x948] sm:$0xff]  ;;  %v1757_v4 = vpack.c.bf16 %v413_v62, %v409_v58  ;;  %v417_v6 = vld [vmem:[#allocation5 + $0x940] sm:$0xff]  ;;  %v184_v27 = vld [vmem:[#allocation5 + $0x1f8] sm:$0xff] }
  0xcb   :  { %1748 = vmatprep.subr.bf16.mxu0 %v1747_v38  ;;  %v422_v2 = vld [vmem:[#allocation5 + $0x968] sm:$0xff]  ;;  %v421_v10 = vld [vmem:[#allocation5 + $0x960] sm:$0xff]  ;;  %v2590_v28 = vld [vmem:[#allocation2 + $0x28] sm:$0xff]  ;;  %v1863_v33 = vpack.c.bf16 %v184_v27, %v180_v26 }
  0xcc   :  { %v1759_v9 = vpack.c.bf16 %v422_v2, %v418_v1  ;;  %v426_v13 = vld [vmem:[#allocation5 + $0x988] sm:$0xff]  ;;  %v425_v18 = vld [vmem:[#allocation5 + $0x980] sm:$0xff]  ;;  %v1761_v20 = vpack.c.bf16 %v421_v10, %v417_v6  ;;  %797 = vmatprep.mubr.f32.mxu0 %v2590_v28  ;;  %v179_v35 = vld [vmem:[#allocation5 + $0x1d0] sm:$0xff] }
  0xcd   :  { %1846 = vmatpush1.bf16.msra.mxu1 %v1845_v44  ;;  %v430_v14 = vld [vmem:[#allocation5 + $0x9a8] sm:$0xff]  ;;  %v429_v22 = vld [vmem:[#allocation5 + $0x9a0] sm:$0xff]  ;;  %v183_v36 = vld [vmem:[#allocation5 + $0x1f0] sm:$0xff] }
  0xce   :  { %1750 = vmatpush1.bf16.msra.mxu0 %v1749_v45  ;;  %1848 = vmatprep.subr.bf16.mxu1 %v1847_v46  ;;  %v1763_v25 = vpack.c.bf16 %v430_v14, %v426_v13  ;;  %v434_v29 = vld [vmem:[#allocation5 + $0x9c8] sm:$0xff]  ;;  %v1765_v32 = vpack.c.bf16 %v429_v22, %v425_v18  ;;  %v433_v34 = vld [vmem:[#allocation5 + $0x9c0] sm:$0xff]  ;;  %v188_v39 = vld [vmem:[#allocation5 + $0x218] sm:$0xff]  ;;  %v1865_v43 = vpack.c.bf16 %v183_v36, %v179_v35 }
  0xcf   :  { %1752 = vmatprep.subr.bf16.mxu0 %v1751_v50  ;;  %v438_v30 = vld [vmem:[#allocation5 + $0x9e8] sm:$0xff]  ;;  %v437_v38 = vld [vmem:[#allocation5 + $0x9e0] sm:$0xff]  ;;  %v192_v40 = vld [vmem:[#allocation5 + $0x238] sm:$0xff] }
  0xd0   :  { %v1767_v37 = vpack.c.bf16 %v438_v30, %v434_v29  ;;  %v442_v41 = vld [vmem:[#allocation5 + $0xa08] sm:$0xff]  ;;  %v1769_v44 = vpack.c.bf16 %v437_v38, %v433_v34  ;;  %v1867_v45 = vpack.c.bf16 %v192_v40, %v188_v39  ;;  %v441_v46 = vld [vmem:[#allocation5 + $0xa00] sm:$0xff]  ;;  %v187_v47 = vld [vmem:[#allocation5 + $0x210] sm:$0xff] }
  0xd1   :  { %1850 = vmatpush1.bf16.msra.mxu1 %v1849_v16  ;;  %v446_v42 = vld [vmem:[#allocation5 + $0xa28] sm:$0xff]  ;;  %v191_v48 = vld [vmem:[#allocation5 + $0x230] sm:$0xff]  ;;  %v445_v50 = vld [vmem:[#allocation5 + $0xa20] sm:$0xff] }
  0xd2   :  { %1754 = vmatpush1.bf16.msra.mxu0 %v1753_v56  ;;  %1852 = vmatprep.subr.bf16.mxu1 %v1851_v57  ;;  %v1771_v49 = vpack.c.bf16 %v446_v42, %v442_v41  ;;  %v196_v51 = vld [vmem:[#allocation5 + $0x258] sm:$0xff]  ;;  %v450_v53 = vld [vmem:[#allocation5 + $0xa48] sm:$0xff]  ;;  %v1869_v55 = vpack.c.bf16 %v191_v48, %v187_v47  ;;  %v1773_v16 = vpack.c.bf16 %v445_v50, %v441_v46  ;;  %v449_v57 = vld [vmem:[#allocation5 + $0xa40] sm:$0xff] }
  0xd3   :  { %1756 = vmatprep.subr.bf16.mxu0 %v1755_v61  ;;  %v200_v52 = vld [vmem:[#allocation5 + $0x278] sm:$0xff]  ;;  %v454_v54 = vld [vmem:[#allocation5 + $0xa68] sm:$0xff]  ;;  %v195_v58 = vld [vmem:[#allocation5 + $0x250] sm:$0xff] }
  0xd4   :  { %v1871_v56 = vpack.c.bf16 %v200_v52, %v196_v51  ;;  %v199_v59 = vld [vmem:[#allocation5 + $0x270] sm:$0xff]  ;;  %v1775_v60 = vpack.c.bf16 %v454_v54, %v450_v53  ;;  %v453_v61 = vld [vmem:[#allocation5 + $0xa60] sm:$0xff]  ;;  %v204_v62 = vld [vmem:[#allocation5 + $0x298] sm:$0xff] }
  0xd5   :  { %1854 = vmatpush1.bf16.msra.mxu1 %v1853_v3  ;;  %v208_v63 = vld [vmem:[#allocation5 + $0x2b8] sm:$0xff]  ;;  %v458_v0 = vld [vmem:[#allocation5 + $0xa88] sm:$0xff]  ;;  %v1873_v2 = vpack.c.bf16 %v199_v59, %v195_v58  ;;  %v1777_v3 = vpack.c.bf16 %v453_v61, %v449_v57  ;;  %v203_v6 = vld [vmem:[#allocation5 + $0x290] sm:$0xff] }
  0xd6   :  { %1758 = vmatpush1.bf16.msra.mxu0 %v1757_v4  ;;  %1856 = vmatprep.subr.bf16.mxu1 %v1855_v5  ;;  %v462_v1 = vld [vmem:[#allocation5 + $0xaa8] sm:$0xff]  ;;  %v1875_v4 = vpack.c.bf16 %v208_v63, %v204_v62  ;;  %v457_v5 = vld [vmem:[#allocation5 + $0xa80] sm:$0xff]  ;;  %v207_v7 = vld [vmem:[#allocation5 + $0x2b0] sm:$0xff] }
  0xd7   :  { %1760 = vmatprep.subr.bf16.mxu0 %v1759_v9  ;;  %v1779_v8 = vpack.c.bf16 %v462_v1, %v458_v0  ;;  %v461_v9 = vld [vmem:[#allocation5 + $0xaa0] sm:$0xff]  ;;  %v212_v10 = vld [vmem:[#allocation5 + $0x2d8] sm:$0xff]  ;;  %v466_v12 = vld [vmem:[#allocation5 + $0xac8] sm:$0xff]  ;;  %v1877_v14 = vpack.c.bf16 %v207_v7, %v203_v6 }
  0xd8   :  { %v216_v11 = vld [vmem:[#allocation5 + $0x2f8] sm:$0xff]  ;;  %v470_v13 = vld [vmem:[#allocation5 + $0xae8] sm:$0xff]  ;;  %v215_v22 = vld [vmem:[#allocation5 + $0x2f0] sm:$0xff] }
  0xd9   :  { %1858 = vmatpush1.bf16.msra.mxu1 %v1857_v15  ;;  %v1781_v15 = vpack.c.bf16 %v461_v9, %v457_v5  ;;  %v1879_v18 = vpack.c.bf16 %v216_v11, %v212_v10  ;;  %v1783_v23 = vpack.c.bf16 %v470_v13, %v466_v12  ;;  %v469_v24 = vld [vmem:[#allocation5 + $0xae0] sm:$0xff]  ;;  %v224_v26 = vld [vmem:[#allocation5 + $0x338] sm:$0xff]  ;;  %v474_v27 = vld [vmem:[#allocation5 + $0xb08] sm:$0xff] }
  0xda   :  { %1762 = vmatpush1.bf16.msra.mxu0 %v1761_v20  ;;  %1860 = vmatprep.subr.bf16.mxu1 %v1859_v21  ;;  %v465_v20 = vld [vmem:[#allocation5 + $0xac0] sm:$0xff]  ;;  %v211_v21 = vld [vmem:[#allocation5 + $0x2d0] sm:$0xff]  ;;  %v478_v29 = vld [vmem:[#allocation5 + $0xb28] sm:$0xff] }
  0xdb   :  { %1764 = vmatprep.subr.bf16.mxu0 %v1763_v25  ;;  %v220_v25 = vld [vmem:[#allocation5 + $0x318] sm:$0xff]  ;;  %v1881_v30 = vpack.c.bf16 %v215_v22, %v211_v21  ;;  %v219_v34 = vld [vmem:[#allocation5 + $0x310] sm:$0xff]  ;;  %v1787_v36 = vpack.c.bf16 %v478_v29, %v474_v27  ;;  %v482_v40 = vld [vmem:[#allocation5 + $0xb48] sm:$0xff] }
  0xdc   :  { %v223_v35 = vld [vmem:[#allocation5 + $0x330] sm:$0xff]  ;;  %v228_v38 = vld [vmem:[#allocation5 + $0x358] sm:$0xff]  ;;  %v486_v41 = vld [vmem:[#allocation5 + $0xb68] sm:$0xff] }
  0xdd   :  { %1862 = vmatpush1.bf16.msra.mxu1 %v1861_v31  ;;  %v1785_v31 = vpack.c.bf16 %v469_v24, %v465_v20  ;;  %v232_v39 = vld [vmem:[#allocation5 + $0x378] sm:$0xff]  ;;  %v1885_v42 = vpack.c.bf16 %v223_v35, %v219_v34  ;;  %v227_v46 = vld [vmem:[#allocation5 + $0x350] sm:$0xff]  ;;  %v1791_v48 = vpack.c.bf16 %v486_v41, %v482_v40  ;;  %v490_v52 = vld [vmem:[#allocation5 + $0xb88] sm:$0xff] }
  0xde   :  { %1766 = vmatpush1.bf16.msra.mxu0 %v1765_v32  ;;  %1864 = vmatprep.subr.bf16.mxu1 %v1863_v33  ;;  %v1883_v32 = vpack.c.bf16 %v224_v26, %v220_v25  ;;  %v473_v33 = vld [vmem:[#allocation5 + $0xb00] sm:$0xff]  ;;  %v231_v47 = vld [vmem:[#allocation5 + $0x370] sm:$0xff]  ;;  %v236_v50 = vld [vmem:[#allocation5 + $0x398] sm:$0xff] }
  0xdf   :  { %1768 = vmatprep.subr.bf16.mxu0 %v1767_v37  ;;  %v477_v37 = vld [vmem:[#allocation5 + $0xb20] sm:$0xff]  ;;  %v240_v51 = vld [vmem:[#allocation5 + $0x3b8] sm:$0xff]  ;;  %v494_v53 = vld [vmem:[#allocation5 + $0xba8] sm:$0xff]  ;;  %v1889_v54 = vpack.c.bf16 %v231_v47, %v227_v46 }
  0xe0   :  { %v235_v57 = vld [vmem:[#allocation5 + $0x390] sm:$0xff]  ;;  %v1795_v59 = vpack.c.bf16 %v494_v53, %v490_v52  ;;  %v244_v61 = vld [vmem:[#allocation5 + $0x3d8] sm:$0xff]  ;;  %v498_v63 = vld [vmem:[#allocation5 + $0xbc8] sm:$0xff]  ;;  %v2454_v52 = vmov 0.0  }
  0xe1   :  { %1866 = vmatpush1.bf16.msra.mxu1 %v1865_v43  ;;  %v1789_v43 = vpack.c.bf16 %v477_v37, %v473_v33  ;;  %v239_v58 = vld [vmem:[#allocation5 + $0x3b0] sm:$0xff]  ;;  %v248_v62 = vld [vmem:[#allocation5 + $0x3f8] sm:$0xff]  ;;  %v502_v0 = vld [vmem:[#allocation5 + $0xbe8] sm:$0xff] }
  0xe2   :  { %1770 = vmatpush1.bf16.msra.mxu0 %v1769_v44  ;;  %1868 = vmatprep.subr.bf16.mxu1 %v1867_v45  ;;  %v1887_v44 = vpack.c.bf16 %v232_v39, %v228_v38  ;;  %v481_v45 = vld [vmem:[#allocation5 + $0xb40] sm:$0xff]  ;;  %v1893_v1 = vpack.c.bf16 %v239_v58, %v235_v57  ;;  %v243_v5 = vld [vmem:[#allocation5 + $0x3d0] sm:$0xff]  ;;  %v1799_v7 = vpack.c.bf16 %v502_v0, %v498_v63  ;;  %v252_v9 = vld [vmem:[#allocation5 + $0x418] sm:$0xff] }
  0xe3   :  { %1772 = vmatprep.subr.bf16.mxu0 %v1771_v49  ;;  %v485_v49 = vld [vmem:[#allocation5 + $0xb60] sm:$0xff]  ;;  %v247_v6 = vld [vmem:[#allocation5 + $0x3f0] sm:$0xff]  ;;  %v256_v10 = vld [vmem:[#allocation5 + $0x438] sm:$0xff] }
  0xe4   :  { %v506_v11 = vld [vmem:[#allocation5 + $0xc08] sm:$0xff]  ;;  %v1897_v13 = vpack.c.bf16 %v247_v6, %v243_v5  ;;  %v251_v20 = vld [vmem:[#allocation5 + $0x410] sm:$0xff]  ;;  %v260_v24 = vld [vmem:[#allocation5 + $0x458] sm:$0xff] }
  0xe5   :  { %1870 = vmatpush1.bf16.msra.mxu1 %v1869_v55  ;;  %v1793_v55 = vpack.c.bf16 %v485_v49, %v481_v45  ;;  %v510_v12 = vld [vmem:[#allocation5 + $0xc28] sm:$0xff]  ;;  %v255_v21 = vld [vmem:[#allocation5 + $0x430] sm:$0xff]  ;;  %v264_v25 = vld [vmem:[#allocation5 + $0x478] sm:$0xff] }
  0xe6   :  { %1774 = vmatpush1.bf16.msra.mxu0 %v1773_v16  ;;  %1872 = vmatprep.subr.bf16.mxu1 %v1871_v56  ;;  %v1891_v16 = vpack.c.bf16 %v240_v51, %v236_v50  ;;  %v489_v56 = vld [vmem:[#allocation5 + $0xb80] sm:$0xff]  ;;  %v1803_v22 = vpack.c.bf16 %v510_v12, %v506_v11  ;;  %v514_v26 = vld [vmem:[#allocation5 + $0xc48] sm:$0xff]  ;;  %v259_v34 = vld [vmem:[#allocation5 + $0x450] sm:$0xff] }
  0xe7   :  { %1776 = vmatprep.subr.bf16.mxu0 %v1775_v60  ;;  %v493_v60 = vld [vmem:[#allocation5 + $0xba0] sm:$0xff]  ;;  %v518_v27 = vld [vmem:[#allocation5 + $0xc68] sm:$0xff]  ;;  %v263_v35 = vld [vmem:[#allocation5 + $0x470] sm:$0xff] }
  0xe8   :  { %v2593_v29 = vld [vmem:[#allocation2 + $0x20] sm:$0xff]  ;;  %v513_v33 = vld [vmem:[#allocation5 + $0xc40] sm:$0xff]  ;;  %v268_v38 = vld [vmem:[#allocation5 + $0x498] sm:$0xff] }
  0xe9   :  { %1874 = vmatpush1.bf16.msra.mxu1 %v1873_v2  ;;  %v1797_v2 = vpack.c.bf16 %v493_v60, %v489_v56  ;;  %v517_v37 = vld [vmem:[#allocation5 + $0xc60] sm:$0xff]  ;;  %v272_v39 = vld [vmem:[#allocation5 + $0x4b8] sm:$0xff]  ;;  %v522_v40 = vld [vmem:[#allocation5 + $0xc88] sm:$0xff] }
  0xea   :  { %1778 = vmatpush1.bf16.msra.mxu0 %v1777_v3  ;;  %1876 = vmatprep.subr.bf16.mxu1 %v1875_v4  ;;  %v1895_v3 = vpack.c.bf16 %v248_v62, %v244_v61  ;;  %v497_v4 = vld [vmem:[#allocation5 + $0xbc0] sm:$0xff]  ;;  %v526_v41 = vld [vmem:[#allocation5 + $0xca8] sm:$0xff]  ;;  %v267_v46 = vld [vmem:[#allocation5 + $0x490] sm:$0xff] }
  0xeb   :  { %1780 = vmatprep.subr.bf16.mxu0 %v1779_v8  ;;  %v501_v8 = vld [vmem:[#allocation5 + $0xbe0] sm:$0xff]  ;;  %v271_v47 = vld [vmem:[#allocation5 + $0x4b0] sm:$0xff]  ;;  %v276_v50 = vld [vmem:[#allocation5 + $0x4d8] sm:$0xff] }
  0xec   :  { %v521_v45 = vld [vmem:[#allocation5 + $0xc80] sm:$0xff]  ;;  %v280_v51 = vld [vmem:[#allocation5 + $0x4f8] sm:$0xff]  ;;  %v534_v53 = vld [vmem:[#allocation5 + $0xce8] sm:$0xff] }
  0xed   :  { %1878 = vmatpush1.bf16.msra.mxu1 %v1877_v14  ;;  %v1801_v14 = vpack.c.bf16 %v501_v8, %v497_v4  ;;  %v525_v49 = vld [vmem:[#allocation5 + $0xca0] sm:$0xff]  ;;  %v275_v57 = vld [vmem:[#allocation5 + $0x4d0] sm:$0xff]  ;;  %v284_v61 = vld [vmem:[#allocation5 + $0x518] sm:$0xff] }
  0xee   :  { %1782 = vmatpush1.bf16.msra.mxu0 %v1781_v15  ;;  %1880 = vmatprep.subr.bf16.mxu1 %v1879_v18  ;;  %v1899_v15 = vpack.c.bf16 %v256_v10, %v252_v9  ;;  %v505_v18 = vld [vmem:[#allocation5 + $0xc00] sm:$0xff]  ;;  %v279_v58 = vld [vmem:[#allocation5 + $0x4f0] sm:$0xff]  ;;  %v288_v62 = vld [vmem:[#allocation5 + $0x538] sm:$0xff] }
  0xef   :  { %1784 = vmatprep.subr.bf16.mxu0 %v1783_v23  ;;  %v509_v23 = vld [vmem:[#allocation5 + $0xc20] sm:$0xff]  ;;  %v538_v63 = vld [vmem:[#allocation5 + $0xd08] sm:$0xff]  ;;  %v283_v4 = vld [vmem:[#allocation5 + $0x510] sm:$0xff] }
  0xf0   :  { %v529_v56 = vld [vmem:[#allocation5 + $0xcc0] sm:$0xff]  ;;  %v542_v0 = vld [vmem:[#allocation5 + $0xd28] sm:$0xff]  ;;  %v287_v5 = vld [vmem:[#allocation5 + $0x530] sm:$0xff] }
  0xf1   :  { %1882 = vmatpush1.bf16.msra.mxu1 %v1881_v30  ;;  %v1901_v30 = vpack.c.bf16 %v255_v21, %v251_v20  ;;  %v533_v60 = vld [vmem:[#allocation5 + $0xce0] sm:$0xff]  ;;  %v1819_v6 = vpack.c.bf16 %v542_v0, %v538_v63  ;;  %v292_v8 = vld [vmem:[#allocation5 + $0x558] sm:$0xff]  ;;  %v546_v10 = vld [vmem:[#allocation5 + $0xd48] sm:$0xff]  ;;  %v1917_v12 = vpack.c.bf16 %v287_v5, %v283_v4 }
  0xf2   :  { %1786 = vmatpush1.bf16.msra.mxu0 %v1785_v31  ;;  %1884 = vmatprep.subr.bf16.mxu1 %v1883_v32  ;;  %v1805_v31 = vpack.c.bf16 %v509_v23, %v505_v18  ;;  %v1903_v32 = vpack.c.bf16 %v264_v25, %v260_v24  ;;  %v296_v9 = vld [vmem:[#allocation5 + $0x578] sm:$0xff]  ;;  %v550_v11 = vld [vmem:[#allocation5 + $0xd68] sm:$0xff]  ;;  %v291_v18 = vld [vmem:[#allocation5 + $0x550] sm:$0xff] }
  0xf3   :  { %1788 = vmatprep.subr.bf16.mxu0 %v1787_v36  ;;  %v1807_v36 = vpack.c.bf16 %v518_v27, %v514_v26  ;;  %v295_v20 = vld [vmem:[#allocation5 + $0x570] sm:$0xff]  ;;  %v1823_v21 = vpack.c.bf16 %v550_v11, %v546_v10  ;;  %v300_v23 = vld [vmem:[#allocation5 + $0x598] sm:$0xff]  ;;  %v554_v25 = vld [vmem:[#allocation5 + $0xd88] sm:$0xff] }
  0xf4   :  { %v304_v24 = vld [vmem:[#allocation5 + $0x5b8] sm:$0xff]  ;;  %v558_v26 = vld [vmem:[#allocation5 + $0xda8] sm:$0xff]  ;;  %v1921_v27 = vpack.c.bf16 %v295_v20, %v291_v18  ;;  %v331_v0 = vld [vmem:[#allocation5 + $0x690] sm:$0xff] }
  0xf5   :  { %1886 = vmatpush1.bf16.msra.mxu1 %v1885_v42  ;;  %v1905_v42 = vpack.c.bf16 %v263_v35, %v259_v34  ;;  %v303_v34 = vld [vmem:[#allocation5 + $0x5b0] sm:$0xff]  ;;  %v1827_v35 = vpack.c.bf16 %v558_v26, %v554_v25  ;;  %v336_v63 = vld [vmem:[#allocation5 + $0x6b8] sm:$0xff]  ;;  %v1171_v25 = vld [vmem:[#allocation8 + $0x40] sm:$0xff] }
  0xf6   :  { %1790 = vmatpush1.bf16.msra.mxu0 %v1789_v43  ;;  %1888 = vmatprep.subr.bf16.mxu1 %v1887_v44  ;;  %v1809_v43 = vpack.c.bf16 %v517_v37, %v513_v33  ;;  %v1907_v44 = vpack.c.bf16 %v272_v39, %v268_v38  ;;  %v299_v33 = vld [vmem:[#allocation5 + $0x590] sm:$0xff]  ;;  %v308_v37 = vld [vmem:[#allocation5 + $0x5d8] sm:$0xff]  ;;  %v562_v39 = vld [vmem:[#allocation5 + $0xdc8] sm:$0xff] }
  0xf7   :  { %1792 = vmatprep.subr.bf16.mxu0 %v1791_v48  ;;  %v1811_v48 = vpack.c.bf16 %v526_v41, %v522_v40  ;;  %v312_v38 = vld [vmem:[#allocation5 + $0x5f8] sm:$0xff]  ;;  %v566_v40 = vld [vmem:[#allocation5 + $0xde8] sm:$0xff]  ;;  %v1925_v41 = vpack.c.bf16 %v303_v34, %v299_v33 }
  0xf8   :  { %v344_v18 = vld [vmem:[#allocation5 + $0x6f8] sm:$0xff] }
  0xf9   :  { %1890 = vmatpush1.bf16.msra.mxu1 %v1889_v54  ;;  %v1909_v54 = vpack.c.bf16 %v271_v47, %v267_v46  ;;  %v311_v46 = vld [vmem:[#allocation5 + $0x5f0] sm:$0xff]  ;;  %v1831_v47 = vpack.c.bf16 %v566_v40, %v562_v39  ;;  %v1174_v20 = vld [vmem:[#allocation8 + $0x58] sm:$0xff]  ;;  %v1175_v39 = vld [vmem:[#allocation8 + $0x60] sm:$0xff] }
  0xfa   :  { %1794 = vmatpush1.bf16.msra.mxu0 %v1793_v55  ;;  %1892 = vmatprep.subr.bf16.mxu1 %v1891_v16  ;;  %v1813_v55 = vpack.c.bf16 %v525_v49, %v521_v45  ;;  %v1911_v16 = vpack.c.bf16 %v280_v51, %v276_v50  ;;  %v307_v45 = vld [vmem:[#allocation5 + $0x5d0] sm:$0xff]  ;;  %v316_v49 = vld [vmem:[#allocation5 + $0x618] sm:$0xff] }
  0xfb   :  { %1796 = vmatprep.subr.bf16.mxu0 %v1795_v59  ;;  %v320_v50 = vld [vmem:[#allocation5 + $0x638] sm:$0xff]  ;;  %v1929_v51 = vpack.c.bf16 %v311_v46, %v307_v45 }
  0xfc   :  { %v1173_v26 = vld [vmem:[#allocation8 + $0x50] sm:$0xff] }
  0xfd   :  { %1894 = vmatpush1.bf16.msra.mxu1 %v1893_v1  ;;  %v1913_v1 = vpack.c.bf16 %v279_v58, %v275_v57  ;;  %v2599_v58 = vld [vmem:[#allocation2 + $0x30] sm:$0xff] }
  0xfe   :  { %1798 = vmatpush1.bf16.msra.mxu0 %v1797_v2  ;;  %1896 = vmatprep.subr.bf16.mxu1 %v1895_v3  ;;  %v1915_v2 = vpack.c.bf16 %v288_v62, %v284_v61  ;;  %v537_v3 = vld [vmem:[#allocation5 + $0xd00] sm:$0xff]  ;;  %v327_v61 = vld [vmem:[#allocation5 + $0x670] sm:$0xff]  ;;  %v332_v62 = vld [vmem:[#allocation5 + $0x698] sm:$0xff] }
  0xff   :  { %1800 = vmatprep.subr.bf16.mxu0 %v1799_v7  ;;  %v541_v7 = vld [vmem:[#allocation5 + $0xd20] sm:$0xff]  ;;  %v348_v33 = vld [vmem:[#allocation5 + $0x718] sm:$0xff] }
 0x100   :  { %v352_v34 = vld [vmem:[#allocation5 + $0x738] sm:$0xff] }
 0x101   :  { %1898 = vmatpush1.bf16.msra.mxu1 %v1897_v13  ;;  %v1821_v13 = vpack.c.bf16 %v541_v7, %v537_v3  ;;  %v1163_v3 = vld [vmem:[#allocation8] sm:$0xff]  ;;  %v1168_v7 = vld [vmem:[#allocation8 + $0x28] sm:$0xff]  ;;  %v1177_v40 = vld [vmem:[#allocation8 + $0x70] sm:$0xff] }
 0x102   :  { %1802 = vmatpush1.bf16.msra.mxu0 %v1801_v14  ;;  %1900 = vmatprep.subr.bf16.mxu1 %v1899_v15  ;;  %v1919_v14 = vpack.c.bf16 %v296_v9, %v292_v8  ;;  %v545_v15 = vld [vmem:[#allocation5 + $0xd40] sm:$0xff]  ;;  %v1939_v9 = vpack.c.bf16 %v336_v63, %v332_v62  ;;  %v356_v45 = vld [vmem:[#allocation5 + $0x758] sm:$0xff] }
 0x103   :  { %1804 = vmatprep.subr.bf16.mxu0 %v1803_v22  ;;  %v549_v22 = vld [vmem:[#allocation5 + $0xd60] sm:$0xff]  ;;  %v360_v46 = vld [vmem:[#allocation5 + $0x778] sm:$0xff] }
 0x104   :  { %940 = vmatmul.mubr.f32.vlgmr.msra.gmra.mrb[2].mxu1 %v2586_v17  ;;  %v530_v17 = vld [vmem:[#allocation5 + $0xcc8] sm:$0xff]  ;;  %v1170_v8 = vld [vmem:[#allocation8 + $0x38] sm:$0xff] }
 0x105   :  { %798 = vmatmul.mubr.f32.vlgmr.msra.gmra.mrb[0].mxu0 %v2593_v29  ;;  %1902 = vmatpush1.bf16.msra.mxu1 %v1901_v30  ;;  %v1815_v59 = vpack.c.bf16 %v534_v53, %v530_v17  ;;  %v1825_v30 = vpack.c.bf16 %v549_v22, %v545_v15  ;;  %v1931_v53 = vpack.c.bf16 %v320_v50, %v316_v49  ;;  %v340_v15 = vld [vmem:[#allocation5 + $0x6d8] sm:$0xff]  ;;  %v355_v49 = vld [vmem:[#allocation5 + $0x750] sm:$0xff]  ;;  %v1183_v63 = vld [vmem:[#allocation8 + $0xa0] sm:$0xff] }
 0x106   :  { %1806 = vmatpush1.bf16.msra.mxu0 %v1805_v31  ;;  %1904 = vmatprep.subr.bf16.mxu1 %v1903_v32  ;;  %v1923_v31 = vpack.c.bf16 %v304_v24, %v300_v23  ;;  %v553_v32 = vld [vmem:[#allocation5 + $0xd80] sm:$0xff]  ;;  %v2063_v11 = vpack.c.bf16 %v1170_v8, %v1168_v7  ;;  %v339_v23 = vld [vmem:[#allocation5 + $0x6d0] sm:$0xff] }
 0x107   :  { %1808 = vmatprep.subr.bf16.mxu0 %v1807_v36  ;;  %868 = vmatprep.mubr.f32.mxu0 %v2454_v52  ;;  %v557_v36 = vld [vmem:[#allocation5 + $0xda0] sm:$0xff]  ;;  %v371_v8 = vld [vmem:[#allocation5 + $0x7d0] sm:$0xff] }
 0x108   :  { %1010 = vmatprep.mubr.f32.mxu1 %v2583_v19  ;;  %v1817_v19 = vpack.c.bf16 %v533_v60, %v529_v56  ;;  %v328_v56 = vld [vmem:[#allocation5 + $0x678] sm:$0xff]  ;;  %v323_v60 = vld [vmem:[#allocation5 + $0x650] sm:$0xff] }
 0x109   :  { %1906 = vmatpush1.bf16.msra.mxu1 %v1905_v42  ;;  %v1829_v42 = vpack.c.bf16 %v557_v36, %v553_v32  ;;  %v1937_v4 = vpack.c.bf16 %v327_v61, %v323_v60  ;;  %v1178_v32 = vld [vmem:[#allocation8 + $0x78] sm:$0xff]  ;;  %v363_v61 = vld [vmem:[#allocation5 + $0x790] sm:$0xff] }
 0x10a   :  { %1810 = vmatpush1.bf16.msra.mxu0 %v1809_v43  ;;  %1908 = vmatprep.subr.bf16.mxu1 %v1907_v44  ;;  %v1927_v43 = vpack.c.bf16 %v312_v38, %v308_v37  ;;  %v561_v44 = vld [vmem:[#allocation5 + $0xdc0] sm:$0xff]  ;;  %v347_v37 = vld [vmem:[#allocation5 + $0x710] sm:$0xff] }
 0x10b   :  { %1812 = vmatprep.subr.bf16.mxu0 %v1811_v48  ;;  %v565_v48 = vld [vmem:[#allocation5 + $0xde0] sm:$0xff] }
 0x10c   :  { %v1833_v17 = vpack.c.bf16 %v565_v48, %v561_v44  ;;  %v1182_v44 = vld [vmem:[#allocation8 + $0x98] sm:$0xff] }
 0x10d   :  { %1910 = vmatpush1.bf16.msra.mxu1 %v1909_v54  ;;  %v315_v54 = vld [vmem:[#allocation5 + $0x610] sm:$0xff] }
 0x10e   :  { %1814 = vmatpush1.bf16.msra.mxu0 %v1813_v55  ;;  %1912 = vmatprep.subr.bf16.mxu1 %v1911_v16  ;;  %v319_v55 = vld [vmem:[#allocation5 + $0x630] sm:$0xff]  ;;  %v324_v16 = vld [vmem:[#allocation5 + $0x658] sm:$0xff] }
 0x10f   :  { %1816 = vmatprep.subr.bf16.mxu0 %v1815_v59  ;;  %v1933_v57 = vpack.c.bf16 %v319_v55, %v315_v54  ;;  %v1935_v59 = vpack.c.bf16 %v328_v56, %v324_v16  ;;  %v359_v54 = vld [vmem:[#allocation5 + $0x770] sm:$0xff]  ;;  %v1186_v16 = vld [vmem:[#allocation8 + $0xb8] sm:$0xff] }
 0x110   :  { %v1184_v55 = vld [vmem:[#allocation8 + $0xa8] sm:$0xff]  ;;  %v364_v56 = vld [vmem:[#allocation5 + $0x798] sm:$0xff]  ;;  %v1953_v60 = vpack.c.bf16 %v359_v54, %v355_v49 }
 0x111   :  { %1914 = vmatpush1.bf16.msra.mxu1 %v1913_v1  ;;  %v335_v1 = vld [vmem:[#allocation5 + $0x6b0] sm:$0xff]  ;;  %v2079_v62 = vpack.c.bf16 %v1186_v16, %v1184_v55 }
 0x112   :  { %1818 = vmatpush1.bf16.msra.mxu0 %v1817_v19  ;;  %1916 = vmatprep.subr.bf16.mxu1 %v1915_v2  ;;  %v1164_v19 = vld [vmem:[#allocation8 + $0x8] sm:$0xff]  ;;  %v1166_v2 = vld [vmem:[#allocation8 + $0x18] sm:$0xff]  ;;  %v1941_v22 = vpack.c.bf16 %v335_v1, %v331_v0  ;;  %v1185_v0 = vld [vmem:[#allocation8 + $0xb0] sm:$0xff] }
 0x113   :  { %1820 = vmatprep.subr.bf16.mxu0 %v1819_v6  ;;  %v2059_v5 = vpack.c.bf16 %v1166_v2, %v1164_v19  ;;  %v1165_v6 = vld [vmem:[#allocation8 + $0x10] sm:$0xff]  ;;  %v1188_v2 = vld [vmem:[#allocation8 + $0xc8] sm:$0xff] }
 0x114   :  { %v2061_v10 = vpack.c.bf16 %v1165_v6, %v1163_v3  ;;  %v367_v19 = vld [vmem:[#allocation5 + $0x7b0] sm:$0xff]  ;;  %v1190_v3 = vld [vmem:[#allocation8 + $0xd8] sm:$0xff]  ;;  %v2081_v6 = vpack.c.bf16 %v1185_v0, %v1183_v63  ;;  %v1203_v0 = vld [vmem:[#allocation8 + $0x140] sm:$0xff] }
 0x115   :  { %1918 = vmatpush1.bf16.msra.mxu1 %v1917_v12  ;;  %v1167_v12 = vld [vmem:[#allocation8 + $0x20] sm:$0xff]  ;;  %v1957_v7 = vpack.c.bf16 %v367_v19, %v363_v61  ;;  %v399_v55 = vld [vmem:[#allocation5 + $0x8b0] sm:$0xff] }
 0x116   :  { %1822 = vmatpush1.bf16.msra.mxu0 %v1821_v13  ;;  %1920 = vmatprep.subr.bf16.mxu1 %v1919_v14  ;;  %v1169_v13 = vld [vmem:[#allocation8 + $0x30] sm:$0xff]  ;;  %v1172_v14 = vld [vmem:[#allocation8 + $0x48] sm:$0xff] }
 0x117   :  { %1824 = vmatprep.subr.bf16.mxu0 %v1823_v21  ;;  %v2065_v21 = vpack.c.bf16 %v1169_v13, %v1167_v12  ;;  %v2067_v24 = vpack.c.bf16 %v1174_v20, %v1172_v14  ;;  %v375_v13 = vld [vmem:[#allocation5 + $0x7f0] sm:$0xff]  ;;  %v384_v20 = vld [vmem:[#allocation5 + $0x838] sm:$0xff] }
 0x118   :  { %v1192_v14 = vld [vmem:[#allocation8 + $0xe8] sm:$0xff] }
 0x119   :  { %1922 = vmatpush1.bf16.msra.mxu1 %v1921_v27  ;;  %v1943_v27 = vpack.c.bf16 %v344_v18, %v340_v15  ;;  %v1194_v15 = vld [vmem:[#allocation8 + $0xf8] sm:$0xff]  ;;  %v1204_v16 = vld [vmem:[#allocation8 + $0x148] sm:$0xff] }
 0x11a   :  { %1826 = vmatpush1.bf16.msra.mxu0 %v1825_v30  ;;  %1924 = vmatprep.subr.bf16.mxu1 %v1923_v31  ;;  %v343_v30 = vld [vmem:[#allocation5 + $0x6f0] sm:$0xff]  ;;  %v380_v18 = vld [vmem:[#allocation5 + $0x818] sm:$0xff] }
 0x11b   :  { %1828 = vmatprep.subr.bf16.mxu0 %v1827_v35  ;;  %v1176_v31 = vld [vmem:[#allocation8 + $0x68] sm:$0xff]  ;;  %v2069_v35 = vpack.c.bf16 %v1173_v26, %v1171_v25  ;;  %v1945_v36 = vpack.c.bf16 %v343_v30, %v339_v23  ;;  %v2087_v23 = vpack.c.bf16 %v1194_v15, %v1192_v14  ;;  %v1193_v25 = vld [vmem:[#allocation8 + $0xf0] sm:$0xff]  ;;  %v1963_v26 = vpack.c.bf16 %v384_v20, %v380_v18  ;;  %v1214_v15 = vld [vmem:[#allocation8 + $0x198] sm:$0xff] }
 0x11c   :  { %v2071_v38 = vpack.c.bf16 %v1178_v32, %v1176_v31  ;;  %v383_v30 = vld [vmem:[#allocation5 + $0x830] sm:$0xff]  ;;  %v388_v31 = vld [vmem:[#allocation5 + $0x858] sm:$0xff] }
 0x11d   :  { %1926 = vmatpush1.bf16.msra.mxu1 %v1925_v41  ;;  %v1947_v41 = vpack.c.bf16 %v352_v34, %v348_v33  ;;  %v392_v32 = vld [vmem:[#allocation5 + $0x878] sm:$0xff]  ;;  %v1196_v33 = vld [vmem:[#allocation8 + $0x108] sm:$0xff] }
 0x11e   :  { %1830 = vmatpush1.bf16.msra.mxu0 %v1829_v42  ;;  %1928 = vmatprep.subr.bf16.mxu1 %v1927_v43  ;;  %v351_v42 = vld [vmem:[#allocation5 + $0x730] sm:$0xff]  ;;  %v1198_v34 = vld [vmem:[#allocation8 + $0x118] sm:$0xff] }
 0x11f   :  { %1832 = vmatprep.subr.bf16.mxu0 %v1831_v47  ;;  %v1180_v43 = vld [vmem:[#allocation8 + $0x88] sm:$0xff]  ;;  %v2073_v47 = vpack.c.bf16 %v1177_v40, %v1175_v39  ;;  %v1949_v48 = vpack.c.bf16 %v351_v42, %v347_v37  ;;  %v1197_v39 = vld [vmem:[#allocation8 + $0x110] sm:$0xff]  ;;  %v1967_v40 = vpack.c.bf16 %v392_v32, %v388_v31  ;;  %v2091_v42 = vpack.c.bf16 %v1198_v34, %v1196_v33  ;;  %v1218_v32 = vld [vmem:[#allocation8 + $0x1b8] sm:$0xff] }
 0x120   :  { %v2075_v50 = vpack.c.bf16 %v1182_v44, %v1180_v43  ;;  %v387_v37 = vld [vmem:[#allocation5 + $0x850] sm:$0xff]  ;;  %v1202_v44 = vld [vmem:[#allocation8 + $0x138] sm:$0xff] }
 0x121   :  { %1930 = vmatpush1.bf16.msra.mxu1 %v1929_v51  ;;  %v1179_v51 = vld [vmem:[#allocation8 + $0x80] sm:$0xff]  ;;  %v1200_v43 = vld [vmem:[#allocation8 + $0x128] sm:$0xff]  ;;  %v420_v18 = vld [vmem:[#allocation5 + $0x958] sm:$0xff] }
 0x122   :  { %1834 = vmatpush1.bf16.msra.mxu0 %v1833_v17  ;;  %1932 = vmatprep.subr.bf16.mxu1 %v1931_v53  ;;  %v1181_v17 = vld [vmem:[#allocation8 + $0x90] sm:$0xff]  ;;  %v1951_v53 = vpack.c.bf16 %v360_v46, %v356_v45  ;;  %v1212_v14 = vld [vmem:[#allocation8 + $0x188] sm:$0xff] }
 0x123   :  { %2060 = vmatprep.subr.bf16.mxu0 %v2059_v5  ;;  %v376_v5 = vld [vmem:[#allocation5 + $0x7f8] sm:$0xff]  ;;  %v407_v19 = vld [vmem:[#allocation5 + $0x8f0] sm:$0xff] }
 0x124   :  { %v396_v45 = vld [vmem:[#allocation5 + $0x898] sm:$0xff]  ;;  %v1216_v31 = vld [vmem:[#allocation8 + $0x1a8] sm:$0xff] }
 0x125   :  { %869 = vmatmul.mubr.f32.vlgmr.msra.gmra.mrb[0].mxu0 %v2599_v58  ;;  %1934 = vmatpush1.bf16.msra.mxu1 %v1933_v57  ;;  %v368_v57 = vld [vmem:[#allocation5 + $0x7b8] sm:$0xff] }
 0x126   :  { %1936 = vmatprep.subr.bf16.mxu1 %v1935_v59  ;;  %2062 = vmatpush1.bf16.msra.mxu0 %v2061_v10  ;;  %v2077_v59 = vpack.c.bf16 %v1181_v17, %v1179_v51  ;;  %v1955_v1 = vpack.c.bf16 %v368_v57, %v364_v56  ;;  %v1187_v10 = vld [vmem:[#allocation8 + $0xc0] sm:$0xff]  ;;  %v400_v46 = vld [vmem:[#allocation5 + $0x8b8] sm:$0xff]  ;;  %v2095_v51 = vpack.c.bf16 %v1202_v44, %v1200_v43  ;;  %v1220_v43 = vld [vmem:[#allocation8 + $0x1c8] sm:$0xff] }
 0x127   :  { %2064 = vmatprep.subr.bf16.mxu0 %v2063_v11  ;;  %v1189_v11 = vld [vmem:[#allocation8 + $0xd0] sm:$0xff]  ;;  %v1199_v17 = vld [vmem:[#allocation8 + $0x120] sm:$0xff]  ;;  %v1971_v54 = vpack.c.bf16 %v400_v46, %v396_v45  ;;  %v1206_v56 = vld [vmem:[#allocation8 + $0x158] sm:$0xff] }
 0x128   :  { %v404_v57 = vld [vmem:[#allocation5 + $0x8d8] sm:$0xff]  ;;  %v2099_v63 = vpack.c.bf16 %v1206_v56, %v1204_v16  ;;  %v443_v56 = vld [vmem:[#allocation5 + $0xa10] sm:$0xff] }
 0x129   :  { %1938 = vmatpush1.bf16.msra.mxu1 %v1937_v4  ;;  %v372_v4 = vld [vmem:[#allocation5 + $0x7d8] sm:$0xff] }
 0x12a   :  { %1940 = vmatprep.subr.bf16.mxu1 %v1939_v9  ;;  %2066 = vmatpush1.bf16.msra.mxu0 %v2065_v21  ;;  %v2083_v9 = vpack.c.bf16 %v1190_v3, %v1188_v2  ;;  %v1959_v12 = vpack.c.bf16 %v376_v5, %v372_v4  ;;  %v2085_v21 = vpack.c.bf16 %v1189_v11, %v1187_v10  ;;  %v1208_v2 = vld [vmem:[#allocation8 + $0x168] sm:$0xff]  ;;  %v1210_v3 = vld [vmem:[#allocation8 + $0x178] sm:$0xff]  ;;  %v1207_v10 = vld [vmem:[#allocation8 + $0x160] sm:$0xff] }
 0x12b   :  { %2068 = vmatprep.subr.bf16.mxu0 %v2067_v24  ;;  %v1191_v24 = vld [vmem:[#allocation8 + $0xe0] sm:$0xff]  ;;  %v412_v4 = vld [vmem:[#allocation5 + $0x918] sm:$0xff] }
 0x12c   :  { %v416_v5 = vld [vmem:[#allocation5 + $0x938] sm:$0xff] }
 0x12d   :  { %1942 = vmatpush1.bf16.msra.mxu1 %v1941_v22  ;;  %v1961_v22 = vpack.c.bf16 %v375_v13, %v371_v8  ;;  %v411_v8 = vld [vmem:[#allocation5 + $0x910] sm:$0xff]  ;;  %v424_v20 = vld [vmem:[#allocation5 + $0x978] sm:$0xff] }
 0x12e   :  { %1944 = vmatprep.subr.bf16.mxu1 %v1943_v27  ;;  %2070 = vmatpush1.bf16.msra.mxu0 %v2069_v35  ;;  %v379_v27 = vld [vmem:[#allocation5 + $0x810] sm:$0xff]  ;;  %v2089_v35 = vpack.c.bf16 %v1193_v25, %v1191_v24  ;;  %v2107_v24 = vpack.c.bf16 %v1214_v15, %v1212_v14  ;;  %v1211_v25 = vld [vmem:[#allocation8 + $0x180] sm:$0xff]  ;;  %v428_v33 = vld [vmem:[#allocation5 + $0x998] sm:$0xff] }
 0x12f   :  { %2072 = vmatprep.subr.bf16.mxu0 %v2071_v38  ;;  %v1195_v38 = vld [vmem:[#allocation8 + $0x100] sm:$0xff]  ;;  %v1209_v11 = vld [vmem:[#allocation8 + $0x170] sm:$0xff]  ;;  %v1222_v44 = vld [vmem:[#allocation8 + $0x1d8] sm:$0xff] }
 0x130   :  { %v415_v13 = vld [vmem:[#allocation5 + $0x930] sm:$0xff]  ;;  %v432_v34 = vld [vmem:[#allocation5 + $0x9b8] sm:$0xff] }
 0x131   :  { %1946 = vmatpush1.bf16.msra.mxu1 %v1945_v36  ;;  %v1965_v36 = vpack.c.bf16 %v383_v30, %v379_v27  ;;  %v1983_v27 = vpack.c.bf16 %v424_v20, %v420_v18  ;;  %v423_v30 = vld [vmem:[#allocation5 + $0x970] sm:$0xff]  ;;  %v436_v45 = vld [vmem:[#allocation5 + $0x9d8] sm:$0xff] }
 0x132   :  { %1948 = vmatprep.subr.bf16.mxu1 %v1947_v41  ;;  %2074 = vmatpush1.bf16.msra.mxu0 %v2073_v47  ;;  %v391_v41 = vld [vmem:[#allocation5 + $0x870] sm:$0xff]  ;;  %v2254_v47 = vld [vmem:[#allocation2 + $0x10] sm:$0xff] }
 0x133   :  { %2076 = vmatprep.subr.bf16.mxu0 %v2075_v50  ;;  %v1969_v49 = vpack.c.bf16 %v391_v41, %v387_v37  ;;  %v395_v50 = vld [vmem:[#allocation5 + $0x890] sm:$0xff]  ;;  %v1987_v41 = vpack.c.bf16 %v432_v34, %v428_v33  ;;  %v440_v46 = vld [vmem:[#allocation5 + $0x9f8] sm:$0xff] }
 0x134   :  { %v1973_v61 = vpack.c.bf16 %v399_v55, %v395_v50  ;;  %v427_v37 = vld [vmem:[#allocation5 + $0x990] sm:$0xff]  ;;  %v1991_v50 = vpack.c.bf16 %v440_v46, %v436_v45  ;;  %v484_v20 = vld [vmem:[#allocation5 + $0xb58] sm:$0xff] }
 0x135   :  { %1950 = vmatpush1.bf16.msra.mxu1 %v1949_v48  ;;  %v2093_v48 = vpack.c.bf16 %v1197_v39, %v1195_v38  ;;  %v2111_v38 = vpack.c.bf16 %v1218_v32, %v1216_v31  ;;  %v1215_v39 = vld [vmem:[#allocation8 + $0x1a0] sm:$0xff]  ;;  %v475_v15 = vld [vmem:[#allocation5 + $0xb10] sm:$0xff] }
 0x136   :  { %1952 = vmatprep.subr.bf16.mxu1 %v1951_v53  ;;  %2078 = vmatpush1.bf16.msra.mxu0 %v2077_v59  ;;  %v1201_v53 = vld [vmem:[#allocation8 + $0x130] sm:$0xff]  ;;  %v1219_v31 = vld [vmem:[#allocation8 + $0x1c0] sm:$0xff] }
 0x137   :  { %2080 = vmatprep.subr.bf16.mxu0 %v2079_v62  ;;  %v408_v59 = vld [vmem:[#allocation5 + $0x8f8] sm:$0xff]  ;;  %v403_v62 = vld [vmem:[#allocation5 + $0x8d0] sm:$0xff] }
 0x138   :  { %v479_v18 = vld [vmem:[#allocation5 + $0xb30] sm:$0xff] }
 0x139   :  { %1954 = vmatpush1.bf16.msra.mxu1 %v1953_v60  ;;  %v2097_v60 = vpack.c.bf16 %v1201_v53, %v1199_v17  ;;  %v439_v17 = vld [vmem:[#allocation5 + $0x9f0] sm:$0xff]  ;;  %v444_v53 = vld [vmem:[#allocation5 + $0xa18] sm:$0xff] }
 0x13a   :  { %1956 = vmatprep.subr.bf16.mxu1 %v1955_v1  ;;  %2082 = vmatpush1.bf16.msra.mxu0 %v2081_v6  ;;  %v1975_v1 = vpack.c.bf16 %v408_v59, %v404_v57  ;;  %v447_v57 = vld [vmem:[#allocation5 + $0xa30] sm:$0xff]  ;;  %v452_v59 = vld [vmem:[#allocation5 + $0xa58] sm:$0xff] }
 0x13b   :  { %2084 = vmatprep.subr.bf16.mxu0 %v2083_v9  ;;  %v2103_v9 = vpack.c.bf16 %v1210_v3, %v1208_v2  ;;  %v459_v3 = vld [vmem:[#allocation5 + $0xa90] sm:$0xff] }
 0x13c   :  { %v1221_v32 = vld [vmem:[#allocation8 + $0x1d0] sm:$0xff] }
 0x13d   :  { %1958 = vmatpush1.bf16.msra.mxu1 %v1957_v7  ;;  %v1977_v7 = vpack.c.bf16 %v407_v19, %v403_v62  ;;  %v491_v34 = vld [vmem:[#allocation5 + $0xb90] sm:$0xff] }
 0x13e   :  { %1960 = vmatprep.subr.bf16.mxu1 %v1959_v12  ;;  %2086 = vmatpush1.bf16.msra.mxu0 %v2085_v21  ;;  %v1979_v12 = vpack.c.bf16 %v416_v5, %v412_v4  ;;  %v2105_v21 = vpack.c.bf16 %v1209_v11, %v1207_v10  ;;  %v463_v4 = vld [vmem:[#allocation5 + $0xab0] sm:$0xff]  ;;  %v468_v5 = vld [vmem:[#allocation5 + $0xad8] sm:$0xff] }
 0x13f   :  { %2088 = vmatprep.subr.bf16.mxu0 %v2087_v23  ;;  %v419_v23 = vld [vmem:[#allocation5 + $0x950] sm:$0xff]  ;;  %v476_v11 = vld [vmem:[#allocation5 + $0xb18] sm:$0xff] }
 0x140   :  { %v471_v10 = vld [vmem:[#allocation5 + $0xaf0] sm:$0xff] }
 0x141   :  { %1962 = vmatpush1.bf16.msra.mxu1 %v1961_v22  ;;  %v1981_v22 = vpack.c.bf16 %v415_v13, %v411_v8  ;;  %v499_v46 = vld [vmem:[#allocation5 + $0xbd0] sm:$0xff] }
 0x142   :  { %1964 = vmatprep.subr.bf16.mxu1 %v1963_v26  ;;  %2090 = vmatpush1.bf16.msra.mxu0 %v2089_v35  ;;  %v1213_v26 = vld [vmem:[#allocation8 + $0x190] sm:$0xff] }
 0x143   :  { %2092 = vmatprep.subr.bf16.mxu0 %v2091_v42  ;;  %v2109_v35 = vpack.c.bf16 %v1213_v26, %v1211_v25  ;;  %v431_v42 = vld [vmem:[#allocation5 + $0x9b0] sm:$0xff]  ;;  %v492_v26 = vld [vmem:[#allocation5 + $0xb98] sm:$0xff] }
 0x144   :  { %1011 = vmatmul.mubr.f32.vlgmr.msra.gmra.mrb[2].mxu1 %v2254_v47  ;;  %v487_v25 = vld [vmem:[#allocation5 + $0xb70] sm:$0xff] }
 0x145   :  { %1966 = vmatpush1.bf16.msra.mxu1 %v1965_v36  ;;  %1081 = vmatprep.mubr.f32.mxu1 %v2590_v28  ;;  %v1205_v28 = vld [vmem:[#allocation8 + $0x150] sm:$0xff]  ;;  %v1985_v36 = vpack.c.bf16 %v423_v30, %v419_v23 }
 0x146   :  { %1968 = vmatprep.subr.bf16.mxu1 %v1967_v40  ;;  %2094 = vmatpush1.bf16.msra.mxu0 %v2093_v48  ;;  %v2101_v6 = vpack.c.bf16 %v1205_v28, %v1203_v0  ;;  %v1217_v40 = vld [vmem:[#allocation8 + $0x1b0] sm:$0xff]  ;;  %v1989_v48 = vpack.c.bf16 %v431_v42, %v427_v37 }
 0x147   :  { %2096 = vmatprep.subr.bf16.mxu0 %v2095_v51  ;;  %v2113_v47 = vpack.c.bf16 %v1217_v40, %v1215_v39  ;;  %v435_v51 = vld [vmem:[#allocation5 + $0x9d0] sm:$0xff]  ;;  %v460_v28 = vld [vmem:[#allocation5 + $0xa98] sm:$0xff] }
 0x148   :  { %v1993_v55 = vpack.c.bf16 %v439_v17, %v435_v51  ;;  %v455_v0 = vld [vmem:[#allocation5 + $0xa70] sm:$0xff]  ;;  %v500_v37 = vld [vmem:[#allocation5 + $0xbd8] sm:$0xff] }
 0x149   :  { %1970 = vmatpush1.bf16.msra.mxu1 %v1969_v49  ;;  %v2115_v49 = vpack.c.bf16 %v1222_v44, %v1220_v43  ;;  %v1224_v39 = vld [vmem:[#allocation8 + $0x1e8] sm:$0xff]  ;;  %v1226_v40 = vld [vmem:[#allocation8 + $0x1f8] sm:$0xff]  ;;  %v1223_v43 = vld [vmem:[#allocation8 + $0x1e0] sm:$0xff] }
 0x14a   :  { %1972 = vmatprep.subr.bf16.mxu1 %v1971_v54  ;;  %2098 = vmatpush1.bf16.msra.mxu0 %v2097_v60  ;;  %v448_v54 = vld [vmem:[#allocation5 + $0xa38] sm:$0xff]  ;;  %v2119_v42 = vpack.c.bf16 %v1226_v40, %v1224_v39  ;;  %v571_v40 = vlaneseq }
 0x14b   :  { %2100 = vmatprep.subr.bf16.mxu0 %v2099_v63  ;;  %v1995_v16 = vpack.c.bf16 %v448_v54, %v444_v53  ;;  %v456_v60 = vld [vmem:[#allocation5 + $0xa78] sm:$0xff]  ;;  %v451_v63 = vld [vmem:[#allocation5 + $0xa50] sm:$0xff] }
 0x14c   :  { %v1999_v62 = vpack.c.bf16 %v456_v60, %v452_v59  ;;  %v2001_v19 = vpack.c.bf16 %v455_v0, %v451_v63  ;;  %v1225_v44 = vld [vmem:[#allocation8 + $0x1f0] sm:$0xff] }
 0x14d   :  { %1974 = vmatpush1.bf16.msra.mxu1 %v1973_v61  ;;  %v1997_v61 = vpack.c.bf16 %v447_v57, %v443_v56  ;;  %v507_v53 = vld [vmem:[#allocation5 + $0xc10] sm:$0xff]  ;;  %v1230_v57 = vld [vmem:[#allocation8 + $0x218] sm:$0xff] }
 0x14e   :  { %1976 = vmatprep.subr.bf16.mxu1 %v1975_v1  ;;  %2102 = vmatpush1.bf16.msra.mxu0 %v2101_v6  ;;  %v464_v1 = vld [vmem:[#allocation5 + $0xab8] sm:$0xff]  ;;  %v511_v54 = vld [vmem:[#allocation5 + $0xc30] sm:$0xff] }
 0x14f   :  { %2104 = vmatprep.subr.bf16.mxu0 %v2103_v9  ;;  %v2003_v2 = vpack.c.bf16 %v464_v1, %v460_v28  ;;  %v472_v6 = vld [vmem:[#allocation5 + $0xaf8] sm:$0xff]  ;;  %v467_v9 = vld [vmem:[#allocation5 + $0xad0] sm:$0xff]  ;;  %v2029_v60 = vpack.c.bf16 %v511_v54, %v507_v53 }
 0x150   :  { %v2007_v8 = vpack.c.bf16 %v472_v6, %v468_v5  ;;  %v2009_v13 = vpack.c.bf16 %v471_v10, %v467_v9  ;;  %v1228_v56 = vld [vmem:[#allocation8 + $0x208] sm:$0xff]  ;;  %v524_v0 = vld [vmem:[#allocation5 + $0xc98] sm:$0xff] }
 0x151   :  { %1978 = vmatpush1.bf16.msra.mxu1 %v1977_v7  ;;  %v2005_v7 = vpack.c.bf16 %v463_v4, %v459_v3  ;;  %v2123_v59 = vpack.c.bf16 %v1230_v57, %v1228_v56  ;;  %v519_v63 = vld [vmem:[#allocation5 + $0xc70] sm:$0xff]  ;;  %v528_v28 = vld [vmem:[#allocation5 + $0xcb8] sm:$0xff]  ;;  %v1231_v57 = vld [vmem:[#allocation8 + $0x220] sm:$0xff] }
 0x152   :  { %1980 = vmatprep.subr.bf16.mxu1 %v1979_v12  ;;  %2106 = vmatpush1.bf16.msra.mxu0 %v2105_v21  ;;  %v480_v12 = vld [vmem:[#allocation5 + $0xb38] sm:$0xff]  ;;  %v527_v3 = vld [vmem:[#allocation5 + $0xcb0] sm:$0xff] }
 0x153   :  { %2108 = vmatprep.subr.bf16.mxu0 %v2107_v24  ;;  %v2011_v14 = vpack.c.bf16 %v480_v12, %v476_v11  ;;  %v488_v21 = vld [vmem:[#allocation5 + $0xb78] sm:$0xff]  ;;  %v483_v24 = vld [vmem:[#allocation5 + $0xb50] sm:$0xff] }
 0x154   :  { %v2015_v23 = vpack.c.bf16 %v488_v21, %v484_v20  ;;  %v2017_v30 = vpack.c.bf16 %v487_v25, %v483_v24  ;;  %v532_v4 = vld [vmem:[#allocation5 + $0xcd8] sm:$0xff]  ;;  %v535_v9 = vld [vmem:[#allocation5 + $0xcf0] sm:$0xff] }
 0x155   :  { %1982 = vmatpush1.bf16.msra.mxu1 %v1981_v22  ;;  %v2013_v22 = vpack.c.bf16 %v479_v18, %v475_v15  ;;  %v536_v5 = vld [vmem:[#allocation5 + $0xcf8] sm:$0xff]  ;;  %v547_v21 = vld [vmem:[#allocation5 + $0xd50] sm:$0xff] }
 0x156   :  { %1984 = vmatprep.subr.bf16.mxu1 %v1983_v27  ;;  %2110 = vmatpush1.bf16.msra.mxu0 %v2109_v35  ;;  %v496_v27 = vld [vmem:[#allocation5 + $0xbb8] sm:$0xff]  ;;  %v495_v35 = vld [vmem:[#allocation5 + $0xbb0] sm:$0xff] }
 0x157   :  { %2112 = vmatprep.subr.bf16.mxu0 %v2111_v38  ;;  %v2019_v33 = vpack.c.bf16 %v496_v27, %v492_v26  ;;  %v504_v38 = vld [vmem:[#allocation5 + $0xbf8] sm:$0xff]  ;;  %v555_v27 = vld [vmem:[#allocation5 + $0xd90] sm:$0xff] }
 0x158   :  { %v2023_v45 = vpack.c.bf16 %v504_v38, %v500_v37  ;;  %v540_v10 = vld [vmem:[#allocation5 + $0xd18] sm:$0xff]  ;;  %v563_v37 = vld [vmem:[#allocation5 + $0xdd0] sm:$0xff] }
 0x159   :  { %1986 = vmatpush1.bf16.msra.mxu1 %v1985_v36  ;;  %v2117_v36 = vpack.c.bf16 %v1221_v32, %v1219_v31  ;;  %v544_v11 = vld [vmem:[#allocation5 + $0xd38] sm:$0xff]  ;;  %v567_v38 = vld [vmem:[#allocation5 + $0xdf0] sm:$0xff] }
 0x15a   :  { %1988 = vmatprep.subr.bf16.mxu1 %v1987_v41  ;;  %2114 = vmatpush1.bf16.msra.mxu0 %v2113_v47  ;;  %v2021_v41 = vpack.c.bf16 %v495_v35, %v491_v34  ;;  %v503_v47 = vld [vmem:[#allocation5 + $0xbf0] sm:$0xff]  ;;  %v2043_v12 = vpack.c.bf16 %v544_v11, %v540_v10  ;;  %v552_v15 = vld [vmem:[#allocation5 + $0xd78] sm:$0xff]  ;;  %v2057_v39 = vpack.c.bf16 %v567_v38, %v563_v37  ;;  %v1467_v10 = vld [vmem:[#allocation11 + $0xa0] sm:$0xff] }
 0x15b   :  { %2116 = vmatprep.subr.bf16.mxu0 %v2115_v49  ;;  %v508_v49 = vld [vmem:[#allocation5 + $0xc18] sm:$0xff]  ;;  %v2025_v51 = vpack.c.bf16 %v503_v47, %v499_v46  ;;  %v1232_v54 = vld [vmem:[#allocation8 + $0x228] sm:$0xff] }
 0x15c   :  { %v560_v24 = vld [vmem:[#allocation5 + $0xdb8] sm:$0xff]  ;;  %v1471_v37 = vld [vmem:[#allocation11 + $0xc0] sm:$0xff]  ;;  %v1472_v38 = vld [vmem:[#allocation11 + $0xc8] sm:$0xff] }
 0x15d   :  { %1990 = vmatpush1.bf16.msra.mxu1 %v1989_v48  ;;  %v2121_v48 = vpack.c.bf16 %v1225_v44, %v1223_v43  ;;  %v564_v32 = vld [vmem:[#allocation5 + $0xdd8] sm:$0xff]  ;;  %v2609_v43 = vld [vmem:[#allocation7] sm:$0xf] }
 0x15e   :  { %1992 = vmatprep.subr.bf16.mxu1 %v1991_v50  ;;  %2118 = vmatpush1.bf16.msra.mxu0 %v2117_v36  ;;  %v512_v50 = vld [vmem:[#allocation5 + $0xc38] sm:$0xff] }
 0x15f   :  { %2120 = vmatprep.subr.bf16.mxu0 %v2119_v42  ;;  %v2027_v17 = vpack.c.bf16 %v512_v50, %v508_v49 }
 0x161   :  { %1994 = vmatpush1.bf16.msra.mxu1 %v1993_v55  ;;  %v516_v55 = vld [vmem:[#allocation5 + $0xc58] sm:$0xff] }
 0x162   :  { %1996 = vmatprep.subr.bf16.mxu1 %v1995_v16  ;;  %2122 = vmatpush1.bf16.msra.mxu0 %v2121_v48  ;;  %v520_v16 = vld [vmem:[#allocation5 + $0xc78] sm:$0xff] }
 0x163   :  { %2124 = vmatprep.subr.bf16.mxu0 %v2123_v59 }
 0x165   :  { %1998 = vmatpush1.bf16.msra.mxu1 %v1997_v61  ;;  %v2031_v61 = vpack.c.bf16 %v520_v16, %v516_v55  ;;  %v1234_v55 = vld [vmem:[#allocation8 + $0x238] sm:$0xff] }
 0x166   :  { %2000 = vmatprep.subr.bf16.mxu1 %v1999_v62  ;;  %v515_v62 = vld [vmem:[#allocation5 + $0xc50] sm:$0xff] }
 0x167   :  { %v2033_v1 = vpack.c.bf16 %v519_v63, %v515_v62  ;;  %v1236_v62 = vld [vmem:[#allocation8 + $0x248] sm:$0xff]  ;;  %v1238_v63 = vld [vmem:[#allocation8 + $0x258] sm:$0xff] }
 0x168   :  { %v2131_v11 = vpack.c.bf16 %v1238_v63, %v1236_v62  ;;  %v1458_v62 = vld [vmem:[#allocation11 + $0x58] sm:$0xff] }
 0x169   :  { %2002 = vmatpush1.bf16.msra.mxu1 %v2001_v19  ;;  %v2035_v19 = vpack.c.bf16 %v528_v28, %v524_v0  ;;  %v1463_v0 = vld [vmem:[#allocation11 + $0x80] sm:$0xff]  ;;  %v1464_v28 = vld [vmem:[#allocation11 + $0x88] sm:$0xff] }
 0x16a   :  { %2004 = vmatprep.subr.bf16.mxu1 %v2003_v2  ;;  %v523_v2 = vld [vmem:[#allocation5 + $0xc90] sm:$0xff] }
 0x16b   :  { %v2037_v6 = vpack.c.bf16 %v527_v3, %v523_v2  ;;  %v1448_v2 = vld [vmem:[#allocation11 + $0x8] sm:$0xff]  ;;  %v1465_v3 = vld [vmem:[#allocation11 + $0x90] sm:$0xff] }
 0x16d   :  { %2006 = vmatpush1.bf16.msra.mxu1 %v2005_v7  ;;  %v2039_v7 = vpack.c.bf16 %v536_v5, %v532_v4  ;;  %v1466_v4 = vld [vmem:[#allocation11 + $0x98] sm:$0xff] }
 0x16e   :  { %2008 = vmatprep.subr.bf16.mxu1 %v2007_v8  ;;  %v531_v8 = vld [vmem:[#allocation5 + $0xcd0] sm:$0xff] }
 0x171   :  { %2010 = vmatpush1.bf16.msra.mxu1 %v2009_v13  ;;  %v539_v13 = vld [vmem:[#allocation5 + $0xd10] sm:$0xff] }
 0x172   :  { %2012 = vmatprep.subr.bf16.mxu1 %v2011_v14  ;;  %v548_v14 = vld [vmem:[#allocation5 + $0xd58] sm:$0xff] }
 0x173   :  { %v2047_v20 = vpack.c.bf16 %v552_v15, %v548_v14  ;;  %v1242_v14 = vld [vmem:[#allocation8 + $0x278] sm:$0xff] }
 0x175   :  { %2014 = vmatpush1.bf16.msra.mxu1 %v2013_v22  ;;  %v551_v22 = vld [vmem:[#allocation5 + $0xd70] sm:$0xff] }
 0x176   :  { %2016 = vmatprep.subr.bf16.mxu1 %v2015_v23  ;;  %v556_v23 = vld [vmem:[#allocation5 + $0xd98] sm:$0xff]  ;;  %v2049_v25 = vpack.c.bf16 %v551_v22, %v547_v21  ;;  %v1452_v21 = vld [vmem:[#allocation11 + $0x28] sm:$0xff] }
 0x177   :  { %v2051_v26 = vpack.c.bf16 %v560_v24, %v556_v23  ;;  %v1469_v23 = vld [vmem:[#allocation11 + $0xb0] sm:$0xff]  ;;  %v1470_v24 = vld [vmem:[#allocation11 + $0xb8] sm:$0xff] }
 0x179   :  { %2018 = vmatpush1.bf16.msra.mxu1 %v2017_v30  ;;  %v559_v30 = vld [vmem:[#allocation5 + $0xdb0] sm:$0xff] }
 0x17a   :  { %2020 = vmatprep.subr.bf16.mxu1 %v2019_v33  ;;  %v568_v33 = vld [vmem:[#allocation5 + $0xdf8] sm:$0xff]  ;;  %v2053_v35 = vpack.c.bf16 %v559_v30, %v555_v27  ;;  %v1244_v30 = vld [vmem:[#allocation8 + $0x288] sm:$0xff] }
 0x17b   :  { %v2055_v36 = vpack.c.bf16 %v568_v33, %v564_v32  ;;  %v1241_v27 = vld [vmem:[#allocation8 + $0x270] sm:$0xff]  ;;  %v2199_v33 = vpack.c.bf16 %v1470_v24, %v1469_v23  ;;  %v1268_v24 = vld [vmem:[#allocation8 + $0x348] sm:$0xff] }
 0x17c   :  { %v1265_v23 = vld [vmem:[#allocation8 + $0x330] sm:$0xff] }
 0x17d   :  { %2022 = vmatpush1.bf16.msra.mxu1 %v2021_v41  ;;  %v2606_v41 = vshrl.u32 %v571_v40, 7  ;;  %v1243_v40 = vld [vmem:[#allocation8 + $0x280] sm:$0xff] }
 0x17e   :  { %2024 = vmatprep.subr.bf16.mxu1 %v2023_v45 }
 0x17f   :  { %v573_v42 = vsub.s32 0, %v2606_v41  ;;  %v577_v44 = vsub.s32 1, %v2606_v41 }
 0x181   :  { %2026 = vmatpush1.bf16.msra.mxu1 %v2025_v51  ;;  %v574_v45 = vrot.slane %v2609_v43, %v573_v42  ;;  %v578_v46 = vrot.slane %v2609_v43, %v577_v44  ;;  %v1227_v51 = vld [vmem:[#allocation8 + $0x200] sm:$0xff] }
 0x182   :  { %2028 = vmatprep.subr.bf16.mxu1 %v2027_v17  ;;  %v1229_v17 = vld [vmem:[#allocation8 + $0x210] sm:$0xff] }
 0x183   :  { %v2125_v56 = vpack.c.bf16 %v1229_v17, %v1227_v51  ;;  %v1473_v17 = vld [vmem:[#allocation11 + $0xd0] sm:$0xff] }
 0x184   :  { %1082 = vmatmul.mubr.f32.vlgmr.msra.gmra.mrb[2].mxu1 %v2593_v29  ;;  %v2041_v29 = vpack.c.bf16 %v535_v9, %v531_v8  ;;  %v1449_v8 = vld [vmem:[#allocation11 + $0x10] sm:$0xff]  ;;  %v1450_v9 = vld [vmem:[#allocation11 + $0x18] sm:$0xff] }
 0x185   :  { %2030 = vmatpush1.bf16.msra.mxu1 %v2029_v60  ;;  %1152 = vmatprep.mubr.f32.mxu1 %v2454_v52  ;;  %v543_v52 = vld [vmem:[#allocation5 + $0xd30] sm:$0xff]  ;;  %v2127_v60 = vpack.c.bf16 %v1234_v55, %v1232_v54  ;;  %v2193_v15 = vpack.c.bf16 %v1450_v9, %v1449_v8  ;;  %v1247_v55 = vld [vmem:[#allocation8 + $0x2a0] sm:$0xff] }
 0x186   :  { %2032 = vmatprep.subr.bf16.mxu1 %v2031_v61  ;;  %v2045_v18 = vpack.c.bf16 %v543_v52, %v539_v13  ;;  %v1233_v61 = vld [vmem:[#allocation8 + $0x230] sm:$0xff]  ;;  %v1240_v52 = vld [vmem:[#allocation8 + $0x268] sm:$0xff]  ;;  %v1255_v9 = vld [vmem:[#allocation8 + $0x2e0] sm:$0xff] }
 0x187   :  { %v2129_v5 = vpack.c.bf16 %v1233_v61, %v1231_v57  ;;  %v1468_v13 = vld [vmem:[#allocation11 + $0xa8] sm:$0xff]  ;;  %v1254_v57 = vld [vmem:[#allocation8 + $0x2d8] sm:$0xff] }
 0x188   :  { %v1457_v61 = vld [vmem:[#allocation11 + $0x50] sm:$0xff] }
 0x189   :  { %2034 = vmatpush1.bf16.msra.mxu1 %v2033_v1  ;;  %v1447_v1 = vld [vmem:[#allocation11] sm:$0xff] }
 0x18a   :  { %2036 = vmatprep.subr.bf16.mxu1 %v2035_v19  ;;  %v2187_v19 = vpack.c.bf16 %v1464_v28, %v1463_v0  ;;  %v1475_v0 = vld [vmem:[#allocation11 + $0xe0] sm:$0xff]  ;;  %v1476_v28 = vld [vmem:[#allocation11 + $0xe8] sm:$0xff] }
 0x18d   :  { %2038 = vmatpush1.bf16.msra.mxu1 %v2037_v6  ;;  %v2189_v6 = vpack.c.bf16 %v1448_v2, %v1447_v1  ;;  %v1253_v2 = vld [vmem:[#allocation8 + $0x2d0] sm:$0xff] }
 0x18e   :  { %2040 = vmatprep.subr.bf16.mxu1 %v2039_v7  ;;  %v2191_v7 = vpack.c.bf16 %v1466_v4, %v1465_v3  ;;  %v1256_v3 = vld [vmem:[#allocation8 + $0x2e8] sm:$0xff]  ;;  %v1258_v4 = vld [vmem:[#allocation8 + $0x2f8] sm:$0xff] }
 0x18f   :  { %v2151_v8 = vpack.c.bf16 %v1258_v4, %v1256_v3 }
 0x191   :  { %2042 = vmatpush1.bf16.msra.mxu1 %v2041_v29  ;;  %v1235_v29 = vld [vmem:[#allocation8 + $0x240] sm:$0xff] }
 0x192   :  { %2044 = vmatprep.subr.bf16.mxu1 %v2043_v12  ;;  %v1237_v12 = vld [vmem:[#allocation8 + $0x250] sm:$0xff] }
 0x193   :  { %v2133_v22 = vpack.c.bf16 %v1237_v12, %v1235_v29  ;;  %v1262_v29 = vld [vmem:[#allocation8 + $0x318] sm:$0xff] }
 0x195   :  { %2046 = vmatpush1.bf16.msra.mxu1 %v2045_v18  ;;  %v2195_v18 = vpack.c.bf16 %v1468_v13, %v1467_v10  ;;  %v1257_v10 = vld [vmem:[#allocation8 + $0x2f0] sm:$0xff] }
 0x196   :  { %2048 = vmatprep.subr.bf16.mxu1 %v2047_v20  ;;  %v1451_v20 = vld [vmem:[#allocation11 + $0x20] sm:$0xff]  ;;  %v2153_v12 = vpack.c.bf16 %v1257_v10, %v1255_v9 }
 0x197   :  { %v657_v31 = vpop.f32.mrb[0].mxu1  ;;  %v2197_v32 = vpack.c.bf16 %v1452_v21, %v1451_v20  ;;  %v1459_v10 = vld [vmem:[#allocation11 + $0x60] sm:$0xff] }
 0x198   :  { %v659_v34 = vpop.f32.mrb[1].mxu1  ;;  %v658_v47 = vadd.f32 %v657_v31, %v574_v45  ;;  %v1246_v31 = vld [vmem:[#allocation8 + $0x298] sm:$0xff]  ;;  %v1245_v45 = vld [vmem:[#allocation8 + $0x290] sm:$0xff] }
 0x199   :  { %2050 = vmatpush1.bf16.msra.mxu1 %v2049_v25  ;;  %v660_v48 = vadd.f32 %v659_v34, %v578_v46  ;;  %v2135_v25 = vpack.c.bf16 %v1242_v14, %v1240_v52  ;;  %v1453_v34 = vld [vmem:[#allocation11 + $0x30] sm:$0xff]  ;;  %v1248_v46 = vld [vmem:[#allocation8 + $0x2a8] sm:$0xff]  ;;  %v2141_v51 = vpack.c.bf16 %v1245_v45, %v1243_v40  ;;  %v1259_v52 = vld [vmem:[#allocation8 + $0x300] sm:$0xff] }
 0x19a   :  { %2052 = vmatprep.subr.bf16.mxu1 %v2051_v26  ;;  %v1239_v26 = vld [vmem:[#allocation8 + $0x260] sm:$0xff]  ;;  %v1261_v14 = vld [vmem:[#allocation8 + $0x310] sm:$0xff] }
 0x19b   :  { %v2157_v20 = vpack.c.bf16 %v1261_v14, %v1259_v52  ;;  %v1461_v14 = vld [vmem:[#allocation11 + $0x70] sm:$0xff] }
 0x19d   :  { %2054 = vmatpush1.bf16.msra.mxu1 %v2053_v35  ;;  %v1454_v35 = vld [vmem:[#allocation11 + $0x38] sm:$0xff] }
 0x19e   :  { %2056 = vmatprep.subr.bf16.mxu1 %v2055_v36  ;;  %v2137_v36 = vpack.c.bf16 %v1241_v27, %v1239_v26 }
 0x1a1   :  { %2058 = vmatpush1.bf16.msra.mxu1 %v2057_v39  ;;  %v2139_v39 = vpack.c.bf16 %v1246_v31, %v1244_v30  ;;  %v1267_v30 = vld [vmem:[#allocation8 + $0x340] sm:$0xff]  ;;  %v1269_v31 = vld [vmem:[#allocation8 + $0x350] sm:$0xff] }
 0x1a2   :  { %2188 = vmatprep.subr.bf16.mxu1 %v2187_v19  ;;  %v1251_v19 = vld [vmem:[#allocation8 + $0x2c0] sm:$0xff] }
 0x1a4   :  { %1153 = vmatmul.mubr.f32.vlgmr.msra.gmra.mrb[2].mxu1 %v2599_v58 }
 0x1a5   :  { %2190 = vmatpush3.bf16.msra.mxu1 %v2189_v6  ;;  %v2211_v6 = vpack.c.bf16 %v1476_v28, %v1475_v0  ;;  %v1289_v0 = vld [vmem:[#allocation8 + $0x3f0] sm:$0xff] }
 0x1a6   :  { %2192 = vmatprep.subr.bf16.mxu1 %v2191_v7  ;;  %v2149_v7 = vpack.c.bf16 %v1253_v2, %v1251_v19  ;;  %v585_v19 = vsub.s32 3, %v2606_v41 }
 0x1a8   :  { %v586_v3 = vrot.slane %v2609_v43, %v585_v19 }
 0x1a9   :  { %2194 = vmatpush3.bf16.msra.mxu1 %v2193_v15  ;;  %v1264_v15 = vld [vmem:[#allocation8 + $0x328] sm:$0xff] }
 0x1aa   :  { %2196 = vmatprep.subr.bf16.mxu1 %v2195_v18  ;;  %v1266_v18 = vld [vmem:[#allocation8 + $0x338] sm:$0xff] }
 0x1ab   :  { %v2159_v21 = vpack.c.bf16 %v1266_v18, %v1264_v15  ;;  %v1462_v15 = vld [vmem:[#allocation11 + $0x78] sm:$0xff] }
 0x1ac   :  { %v2217_v18 = vpack.c.bf16 %v1462_v15, %v1461_v14 }
 0x1ad   :  { %2198 = vmatpush3.bf16.msra.mxu1 %v2197_v32  ;;  %v1272_v32 = vld [vmem:[#allocation8 + $0x368] sm:$0xff] }
 0x1ae   :  { %2200 = vmatprep.subr.bf16.mxu1 %v2199_v33  ;;  %v1274_v33 = vld [vmem:[#allocation8 + $0x378] sm:$0xff] }
 0x1f8   :  { %v870_v58 = vpop.f32.mrb[0].mxu0 }
 0x1f9   :  { %v2220_v49 = vadd.f32 %v870_v58, %v658_v47  ;;  %v872_v50 = vpop.f32.mrb[1].mxu0  ;;  %v1250_v47 = vld [vmem:[#allocation8 + $0x2b8] sm:$0xff]  ;;  %v2203_v58 = vpack.c.bf16 %v1472_v38, %v1471_v37  ;;  %v1273_v37 = vld [vmem:[#allocation8 + $0x370] sm:$0xff]  ;;  %v1276_v38 = vld [vmem:[#allocation8 + $0x388] sm:$0xff] }
 0x1fa   :  { %v2222_v53 = vadd.f32 %v872_v50, %v660_v48  ;;  %v2201_v48 = vpack.c.bf16 %v1454_v35, %v1453_v34  ;;  %v1456_v50 = vld [vmem:[#allocation11 + $0x48] sm:$0xff]  ;;  %v2143_v54 = vpack.c.bf16 %v1250_v47, %v1248_v46  ;;  %v2165_v34 = vpack.c.bf16 %v1269_v31, %v1267_v30  ;;  %v1275_v46 = vld [vmem:[#allocation8 + $0x380] sm:$0xff] }
 0x1fb   :  { %v1159_v59 = vmax.f32 %v2220_v49, 0.0  ;;  %v1455_v49 = vld [vmem:[#allocation11 + $0x40] sm:$0xff]  ;;  %v2167_v35 = vpack.c.bf16 %v1274_v33, %v1272_v32  ;;  %v1277_v47 = vld [vmem:[#allocation8 + $0x390] sm:$0xff] }
 0x1fc   :  { %v1160_v16 = vmax.f32 %v2222_v53, 0.0  ;;  %v1474_v53 = vld [vmem:[#allocation11 + $0xd8] sm:$0xff]  ;;  %2202 = vmatpush3.bf16.msra.mxu1 %v2201_v48  ;;  %v1280_v48 = vld [vmem:[#allocation8 + $0x3a8] sm:$0xff]  ;;  %v1575_v31 = vld [vmem:[#allocation13] ss:$0 sm:$0xff] }
 0x1fd   :  { %2204 = vmatprep.subr.bf16.mxu1 %v2203_v58  ;;  %v1282_v58 = vld [vmem:[#allocation8 + $0x3b8] sm:$0xff] }
 0x1fe   :  { %1367 = vmatprep.mubr.f32.mxu0 %v1160_v16  ;;  %v1249_v16 = vld [vmem:[#allocation8 + $0x2b0] sm:$0xff] }
 0x1ff   :  { %1368 = vmatmul.mubr.f32.vlgmr.msra.gmra.mrb[2].mxu0 %v1159_v59  ;;  %v2205_v59 = vpack.c.bf16 %v1456_v50, %v1455_v49  ;;  %v2145_v63 = vpack.c.bf16 %v1249_v16, %v1247_v55  ;;  %v2173_v49 = vpack.c.bf16 %v1277_v47, %v1275_v46  ;;  %v2175_v50 = vpack.c.bf16 %v1282_v58, %v1280_v48 }
 0x200   :  { %2126 = vmatpush1.bf16.msra.mxu0 %v2125_v56  ;;  %v1252_v56 = vld [vmem:[#allocation8 + $0x2c8] sm:$0xff] }
 0x201   :  { %2128 = vmatprep.subr.bf16.mxu0 %v2127_v60  ;;  %v2207_v60 = vpack.c.bf16 %v1474_v53, %v1473_v17  ;;  %v2147_v1 = vpack.c.bf16 %v1254_v57, %v1252_v56  ;;  %2206 = vmatpush3.bf16.msra.mxu1 %v2205_v59  ;;  %v1281_v17 = vld [vmem:[#allocation8 + $0x3b0] sm:$0xff]  ;;  %v1284_v53 = vld [vmem:[#allocation8 + $0x3c8] sm:$0xff]  ;;  %v1283_v56 = vld [vmem:[#allocation8 + $0x3c0] sm:$0xff] }
 0x202   :  { %v1285_v57 = vld [vmem:[#allocation8 + $0x3d0] sm:$0xff]  ;;  %v1288_v59 = vld [vmem:[#allocation8 + $0x3e8] sm:$0xff] }
 0x203   :  { %2208 = vmatprep.subr.bf16.mxu1 %v2207_v60  ;;  %v1290_v60 = vld [vmem:[#allocation8 + $0x3f8] sm:$0xff] }
 0x204   :  { %2130 = vmatpush1.bf16.msra.mxu0 %v2129_v5  ;;  %v2209_v5 = vpack.c.bf16 %v1458_v62, %v1457_v61  ;;  %v2181_v61 = vpack.c.bf16 %v1285_v57, %v1283_v56  ;;  %v2183_v62 = vpack.c.bf16 %v1290_v60, %v1288_v59 }
 0x205   :  { %2132 = vmatprep.subr.bf16.mxu0 %v2131_v11  ;;  %v1260_v11 = vld [vmem:[#allocation8 + $0x308] sm:$0xff] }
 0x206   :  { %2210 = vmatpush3.bf16.msra.mxu1 %v2209_v5  ;;  %v2155_v13 = vpack.c.bf16 %v1262_v29, %v1260_v11  ;;  %v1460_v11 = vld [vmem:[#allocation11 + $0x68] sm:$0xff] }
 0x207   :  { %2212 = vmatprep.subr.bf16.mxu1 %v2211_v6  ;;  %v2213_v29 = vpack.c.bf16 %v1460_v11, %v1459_v10 }
 0x208   :  { %2134 = vmatpush1.bf16.msra.mxu0 %v2133_v22  ;;  %v1263_v22 = vld [vmem:[#allocation8 + $0x320] sm:$0xff] }
 0x209   :  { %2136 = vmatprep.subr.bf16.mxu0 %v2135_v25  ;;  %v1270_v25 = vld [vmem:[#allocation8 + $0x358] sm:$0xff]  ;;  %v2161_v26 = vpack.c.bf16 %v1265_v23, %v1263_v22 }
 0x20a   :  { %v2163_v27 = vpack.c.bf16 %v1270_v25, %v1268_v24  ;;  %2214 = vmatpush3.bf16.msra.mxu1 %v2213_v29 }
 0x20c   :  { %2138 = vmatpush1.bf16.msra.mxu0 %v2137_v36  ;;  %v1271_v36 = vld [vmem:[#allocation8 + $0x360] sm:$0xff] }
 0x20d   :  { %2140 = vmatprep.subr.bf16.mxu0 %v2139_v39  ;;  %v1278_v39 = vld [vmem:[#allocation8 + $0x398] sm:$0xff]  ;;  %v2169_v40 = vpack.c.bf16 %v1273_v37, %v1271_v36 }
 0x20e   :  { %v2171_v45 = vpack.c.bf16 %v1278_v39, %v1276_v38 }
 0x210   :  { %2142 = vmatpush1.bf16.msra.mxu0 %v2141_v51  ;;  %v1279_v51 = vld [vmem:[#allocation8 + $0x3a0] sm:$0xff] }
 0x211   :  { %2144 = vmatprep.subr.bf16.mxu0 %v2143_v54  ;;  %v1286_v54 = vld [vmem:[#allocation8 + $0x3d8] sm:$0xff]  ;;  %v2177_v55 = vpack.c.bf16 %v1281_v17, %v1279_v51 }
 0x212   :  { %v2179_v16 = vpack.c.bf16 %v1286_v54, %v1284_v53 }
 0x214   :  { %2146 = vmatpush1.bf16.msra.mxu0 %v2145_v63  ;;  %v1287_v63 = vld [vmem:[#allocation8 + $0x3e0] sm:$0xff] }
 0x215   :  { %2148 = vmatprep.subr.bf16.mxu0 %v2147_v1  ;;  %v2185_v28 = vpack.c.bf16 %v1289_v0, %v1287_v63  ;;  %v581_v1 = vsub.s32 2, %v2606_v41 }
 0x217   :  { %v582_v2 = vrot.slane %v2609_v43, %v581_v1  ;;  %v1291_v43 = vld [vmem:[#allocation10] sm:$0x3] }
 0x218   :  { %2150 = vmatpush1.bf16.msra.mxu0 %v2149_v7 }
 0x219   :  { %2152 = vmatprep.subr.bf16.mxu0 %v2151_v8 }
 0x21c   :  { %2154 = vmatpush1.bf16.msra.mxu0 %v2153_v12  ;;  %v1477_v12 = vld [vmem:[#allocation11 + $0xf0] sm:$0xff] }
 0x21d   :  { %2156 = vmatprep.subr.bf16.mxu0 %v2155_v13  ;;  %v1478_v13 = vld [vmem:[#allocation11 + $0xf8] sm:$0xff] }
 0x21e   :  { %v2215_v52 = vpack.c.bf16 %v1478_v13, %v1477_v12 }
 0x220   :  { %2158 = vmatpush1.bf16.msra.mxu0 %v2157_v20  ;;  %2216 = vmatprep.subr.bf16.mxu1 %v2215_v52  ;;  %v1296_v20 = vrot.slane %v1291_v43, %v573_v42 }
 0x221   :  { %2160 = vmatprep.subr.bf16.mxu0 %v2159_v21  ;;  %2218 = vmatpush3.bf16.msra.mxu1 %v2217_v18  ;;  %v1300_v21 = vrot.slane %v1291_v43, %v577_v44 }
 0x224   :  { %2162 = vmatpush1.bf16.msra.mxu0 %v2161_v26 }
 0x225   :  { %2164 = vmatprep.subr.bf16.mxu0 %v2163_v27 }
 0x228   :  { %2166 = vmatpush1.bf16.msra.mxu0 %v2165_v34 }
 0x229   :  { %2168 = vmatprep.subr.bf16.mxu0 %v2167_v35 }
 0x22c   :  { %2170 = vmatpush1.bf16.msra.mxu0 %v2169_v40 }
 0x22d   :  { %2172 = vmatprep.subr.bf16.mxu0 %v2171_v45 }
 0x230   :  { %2174 = vmatpush1.bf16.msra.mxu0 %v2173_v49 }
 0x231   :  { %2176 = vmatprep.subr.bf16.mxu0 %v2175_v50 }
 0x234   :  { %2178 = vmatpush1.bf16.msra.mxu0 %v2177_v55 }
 0x235   :  { %2180 = vmatprep.subr.bf16.mxu0 %v2179_v16 }
 0x238   :  { %2182 = vmatpush1.bf16.msra.mxu0 %v2181_v61 }
 0x239   :  { %2184 = vmatprep.subr.bf16.mxu0 %v2183_v62 }
 0x23c   :  { %2186 = vmatpush1.bf16.msra.mxu0 %v2185_v28 }
 0x277   :  { %v1154_v4 = vpop.f32.mrb[2].mxu1 }
 0x278   :  { %v2223_v5 = vadd.f32 %v1154_v4, %v582_v2  ;;  %v1156_v6 = vpop.f32.mrb[3].mxu1 }
 0x279   :  { %v2224_v7 = vadd.f32 %v1156_v6, %v586_v3 }
 0x27a   :  { %v1161_v9 = vmax.f32 %v2223_v5, 0.0 }
 0x27b   :  { %v1162_v8 = vmax.f32 %v2224_v7, 0.0 }
 0x27d   :  { %1438 = vmatprep.mubr.f32.mxu0 %v1162_v8 }
 0x27e   :  { %1439 = vmatmul.mubr.f32.vlgmr.msra.gmra.mrb[2].mxu0 %v1161_v9 }
 0x351   :  { %v1440_v22 = vpop.f32.mrb[2].mxu0 }
 0x352   :  { %v2225_v23 = vadd.f32 %v1440_v22, %v1296_v20  ;;  %v1442_v24 = vpop.f32.mrb[3].mxu0 }
 0x353   :  { %v2226_v25 = vadd.f32 %v1442_v24, %v1300_v21 }
 0x354   :  { %v1445_v27 = vmax.f32 %v2225_v23, 0.0 }
 0x355   :  { %v1446_v26 = vmax.f32 %v2226_v25, 0.0 }
 0x357   :  { %1550 = vmatprep.mubr.f32.mxu1 %v1446_v26 }
 0x358   :  { %1551 = vmatmul.mubr.f32.vlgmr.msra.gmra.mrb[4].mxu1 %v1445_v27 }
 0x42b   :  { %v1608_v30 = vpop.f32.mrb[4].mxu1 }
 0x42c   :  { %v1609_v32 = vpop.f32.mrb[5].mxu1 }
 0x42d   :  { %v1610_v33 = vadd.f32 %v1609_v32, %v1608_v30 }
 0x42f   :  { %v1553_v34 = vadd.f32 %v1610_v33, %v1575_v31 }
 0x431   :  { %1556 = vst [vmem:[#allocation14] sm:$0xff] %v1553_v34 }
 0x432   :  { %2420 = shalt.err (!%p2417_p4)
}
 0x433   :  { %s2421_s15 = scalar_lea.hbm %s2645_s7, 128 }
 0x434   :  { %p2422_p5 = scmp.ne.s32.totalorder %s2645_s7, %s2421_s15  ;;  %p2425_p6 = scmp.lt.u32.totalorder %s2421_s15, %s2645_s7 }
 0x436   :  { %p2427_p7 = pnand %p2425_p6, %p2422_p5 }
 0x438   :  { %2430 = shalt.err (!%p2427_p7)
}
 0x439   :  { %1566 = dma.vmem_to_hbm [thread:$0]  %s1564_s13, 128, %s2645_s7, [#allocation4]  }
 0x43a   :  { %2439 = dma.done.wait [#allocation4], 128  }
 0x43b   :  { %2440 = vsyncadd [#allocation4], 4294967168 }
 0x43c   :  { %1570 = vsyncpa [#allocation3], 1 }
 0x43d   :  { %1571 = vsyncpa [#allocation6], 1 }
 0x43e   :  { %1572 = vsyncpa [#allocation9], 1 }
 0x43f   :  { %1573 = vsyncpa [#allocation12], 1 }
 0x440   :  { %1574 = vsyncpa [#allocation4], 1 }

</bundles_post_ra>
